<compile_context>
chip_gen: v7x
topology: tpu7x:2x2x1
jax: 0.10.0
libtpu: 0.0.40
codegen_flags: <defaults>
</compile_context>

<pallas_src>
import functools

import jax
import jax.numpy as jnp
from jax import lax
from jax.experimental import pallas as pl
from jax.experimental.pallas import tpu as pltpu


def _round_up(x, m):
    return ((x + m - 1) // m) * m


def _vmem_limit_bytes():
    """~75% of physical VMEM (v5e/v6e: 128 MiB -> 96 MiB, v7x: 64 MiB -> 48 MiB)."""
    try:
        cap = int(pltpu.get_tpu_info().vmem_capacity_bytes)
    except Exception:  # conservative fallback
        cap = 64 << 20
    return min(int(cap * 3 // 4), 100 << 20)


def _choose_ts(T, tb, K, G, H, vmem_limit):
    """Time-steps per grid block, sized so double-buffered x/out blocks + the
    f32 xg scratch + resident weights/state fit in the VMEM budget."""
    per_step = tb * (2 * 2 * K + 2 * 2 * H + 4 * G)          # x(in) + h(out) dbl-buffered + xg scratch
    fixed = 2 * K * G + 2 * H * G + tb * H * 6 + (2 << 20)   # weights + h/c state + headroom
    budget = max(vmem_limit - fixed, per_step)
    return int(max(1, min(T, budget // per_step, 128)))


# ----------------------------------------------------------------------------
# Pallas kernels
# ----------------------------------------------------------------------------
def _lstm_recurrence(x_ref, w_ih_ref, b_ref, w_hh_ref,
                     xg_scr, hb_scr, c_scr,
                     *, ts, seq_len, guard, out_ref=None):
    """Fused input projection + ts LSTM steps for the current (batch, time) block.

    x_ref   : (ts, TB, K)  bf16  raw layer input block
    w_ih_ref: (K, 4H)      bf16  input weights (gate order i,f,o,g; gate-padded)
    b_ref   : (1, 4H)      f32   b_ih + b_hh
    w_hh_ref: (H, 4H)      bf16  recurrent weights
    xg_scr  : (ts*TB, 4H)  f32   per-block input projection (VMEM scratch)
    hb_scr  : (TB, H)      bf16  h state (bf16: only ever an MXU operand / output)
    c_scr   : (TB, H)      f32   c state (long-horizon, kept f32)
    out_ref : (ts, TB, H)  bf16  per-step hidden states (None for final layer)
    """
    t_blk = pl.program_id(1)

    @pl.when(t_blk == 0)
    def _():
        hb_scr[...] = jnp.zeros_like(hb_scr)
        c_scr[...] = jnp.zeros_like(c_scr)

    TB, H = c_scr.shape
    K = x_ref.shape[-1]

    # Fused hoisted input projection: one big MXU GEMM over the whole block.
    x2d = x_ref[...].reshape(ts * TB, K)
    xg_scr[...] = (
        jnp.dot(x2d, w_ih_ref[...], preferred_element_type=jnp.float32)
        + b_ref[...]
    )

    def step(s, _):
        h_prev = hb_scr[...]                       # bf16, no per-step cast
        c_prev = c_scr[...]
        off = pl.multiple_of(s * TB, TB)
        gates = xg_scr[pl.ds(off, TB), :] + jnp.dot(
            h_prev, w_hh_ref[...], preferred_element_type=jnp.float32)
        # Gate order (i, f, o, g): one wide sigmoid slab + one tanh push.
        sig = jax.nn.sigmoid(gates[:, :3 * H])
        i_g = sig[:, 0 * H:1 * H]
        f_g = sig[:, 1 * H:2 * H]
        o_g = sig[:, 2 * H:3 * H]
        g_g = jnp.tanh(gates[:, 3 * H:4 * H])
        c_new = f_g * c_prev + i_g * g_g
        h_new = (o_g * jnp.tanh(c_new)).astype(jnp.bfloat16)
        if guard:  # mask state updates on padded time steps (T % ts != 0)
            valid = (t_blk * ts + s) < seq_len
            c_new = jnp.where(valid, c_new, c_prev)
            h_new = jnp.where(valid, h_new, h_prev)
        c_scr[...] = c_new
        hb_scr[...] = h_new
        if out_ref is not None:
            out_ref[s] = h_new                     # lane-dense 128-wide store
        return ()

    # Steps are serially dependent: partial unroll keeps scheduler visibility
    # without blowing up instruction memory / vreg live ranges at large ts.
    lax.fori_loop(0, ts, step, (), unroll=min(ts, 8))


def _hidden_kernel(x_ref, w_ih_ref, b_ref, w_hh_ref, out_ref,
                   xg_scr, hb_scr, c_scr, *, ts, seq_len, guard):
    _lstm_recurrence(x_ref, w_ih_ref, b_ref, w_hh_ref, xg_scr, hb_scr, c_scr,
                     ts=ts, seq_len=seq_len, guard=guard, out_ref=out_ref)


def _final_kernel(x_ref, w_ih_ref, b_ref, w_hh_ref, wfc_ref, bfc_ref, out_ref,
                  xg_scr, hb_scr, c_scr, *, ts, seq_len, guard):
    _lstm_recurrence(x_ref, w_ih_ref, b_ref, w_hh_ref, xg_scr, hb_scr, c_scr,
                     ts=ts, seq_len=seq_len, guard=guard, out_ref=None)

    @pl.when(pl.program_id(1) == pl.num_programs(1) - 1)
    def _():
        # Fused FC head on the last valid hidden state; only (TB, C) leaves.
        out_ref[...] = (
            jnp.dot(hb_scr[...], wfc_ref[...], preferred_element_type=jnp.float32)
            + bfc_ref[...]
        ).astype(out_ref.dtype)


# ----------------------------------------------------------------------------
# pallas_call wrappers
# ----------------------------------------------------------------------------
def lstm_hidden_layer(x, w_ih_t, bias, w_hh_t, *, ts, tb, seq_len, vmem_limit):
    """x: (T_pad, B_pad, K) bf16 -> (T_pad, B_pad, H) bf16 hidden states."""
    T_pad, B_pad, K = x.shape
    G = w_hh_t.shape[1]
    H = G // 4
    guard = (T_pad != seq_len)
    kernel = functools.partial(_hidden_kernel, ts=ts, seq_len=seq_len, guard=guard)
    return pl.pallas_call(
        kernel,
        out_shape=jax.ShapeDtypeStruct((T_pad, B_pad, H), jnp.bfloat16),
        grid_spec=pltpu.PrefetchScalarGridSpec(
            num_scalar_prefetch=0,
            grid=(B_pad // tb, T_pad // ts),
            in_specs=[
                pl.BlockSpec((ts, tb, K), lambda b, t: (t, b, 0)),
                pl.BlockSpec((K, G), lambda b, t: (0, 0)),
                pl.BlockSpec((1, G), lambda b, t: (0, 0)),
                pl.BlockSpec((H, G), lambda b, t: (0, 0)),
            ],
            out_specs=pl.BlockSpec((ts, tb, H), lambda b, t: (t, b, 0)),
            scratch_shapes=[
                pltpu.VMEM((ts * tb, G), jnp.float32),   # xg block (never hits HBM)
                pltpu.VMEM((tb, H), jnp.bfloat16),       # h state
                pltpu.VMEM((tb, H), jnp.float32),        # c state
            ],
        ),
        compiler_params=pltpu.CompilerParams(
            dimension_semantics=("parallel", "arbitrary"),
            vmem_limit_bytes=vmem_limit,
        ),
    )(x, w_ih_t, bias, w_hh_t)


def lstm_final_layer(x, w_ih_t, bias, w_hh_t, w_fc_t, b_fc,
                     *, ts, tb, seq_len, vmem_limit):
    """Final LSTM layer with the FC head fused in.  Returns (B_pad, C_pad) f32."""
    T_pad, B_pad, K = x.shape
    G = w_hh_t.shape[1]
    H = G // 4
    C = w_fc_t.shape[1]
    guard = (T_pad != seq_len)
    kernel = functools.partial(_final_kernel, ts=ts, seq_len=seq_len, guard=guard)
    return pl.pallas_call(
        kernel,
        out_shape=jax.ShapeDtypeStruct((B_pad, C), jnp.float32),
        grid_spec=pltpu.PrefetchScalarGridSpec(
            num_scalar_prefetch=0,
            grid=(B_pad // tb, T_pad // ts),
            in_specs=[
                pl.BlockSpec((ts, tb, K), lambda b, t: (t, b, 0)),
                pl.BlockSpec((K, G), lambda b, t: (0, 0)),
                pl.BlockSpec((1, G), lambda b, t: (0, 0)),
                pl.BlockSpec((H, G), lambda b, t: (0, 0)),
                pl.BlockSpec((H, C), lambda b, t: (0, 0)),
                pl.BlockSpec((1, C), lambda b, t: (0, 0)),
            ],
            out_specs=pl.BlockSpec((tb, C), lambda b, t: (b, 0)),
            scratch_shapes=[
                pltpu.VMEM((ts * tb, G), jnp.float32),
                pltpu.VMEM((tb, H), jnp.bfloat16),
                pltpu.VMEM((tb, H), jnp.float32),
            ],
        ),
        compiler_params=pltpu.CompilerParams(
            dimension_semantics=("parallel", "arbitrary"),
            vmem_limit_bytes=vmem_limit,
        ),
    )(x, w_ih_t, bias, w_hh_t, w_fc_t, b_fc)


# ----------------------------------------------------------------------------
# Parameters (PyTorch layout -> padded / reordered / transposed kernel layout)
# ----------------------------------------------------------------------------
def init_raw_params(key, input_size, hidden_size, num_layers, num_classes):
    """Torch-shaped f32 weights: nn.LSTM layer l: W_ih (4H, in_l), W_hh (4H, H),
    b_ih (4H,), b_hh (4H,) in gate order (i, f, g, o); nn.Linear: W (C, H), b (C,)."""
    bound = 1.0 / (hidden_size ** 0.5)
    lstm = []
    for layer in range(num_layers):
        in_l = input_size if layer == 0 else hidden_size
        key, k1, k2, k3, k4 = jax.random.split(key, 5)
        lstm.append(dict(
            w_ih=jax.random.uniform(k1, (4 * hidden_size, in_l), jnp.float32, -bound, bound),
            w_hh=jax.random.uniform(k2, (4 * hidden_size, hidden_size), jnp.float32, -bound, bound),
            b_ih=jax.random.uniform(k3, (4 * hidden_size,), jnp.float32, -bound, bound),
            b_hh=jax.random.uniform(k4, (4 * hidden_size,), jnp.float32, -bound, bound)))
    key, k5, k6 = jax.random.split(key, 3)
    fc = dict(w=jax.random.uniform(k5, (num_classes, hidden_size), jnp.float32, -bound, bound),
              b=jax.random.uniform(k6, (num_classes,), jnp.float32, -bound, bound))
    return {"lstm": lstm, "fc": fc}


def _prep_gates(a, H, H_pad):
    """(..., 4*H) torch gate order (i,f,g,o) -> (..., 4*H_pad) in (i,f,o,g) with
    each gate block padded separately so gate k starts at lane offset k*H_pad."""
    lead = a.shape[:-1]
    a = a.reshape(lead + (4, H))
    a = jnp.take(a, jnp.array([0, 1, 3, 2]), axis=len(lead))   # -> (i, f, o, g)
    a = jnp.pad(a, [(0, 0)] * len(lead) + [(0, 0), (0, H_pad - H)])
    return a.reshape(lead + (4 * H_pad,))


def prepare_params(raw, input_size, hidden_size, num_classes):
    H, I, C = hidden_size, input_size, num_classes
    H_pad = _round_up(H, 128)
    I_pad = _round_up(I, 128)
    C_pad = _round_up(C, 128)
    layers = []
    for l, lp in enumerate(raw["lstm"]):
        in_l = I if l == 0 else H
        in_pad = I_pad if l == 0 else H_pad
        w_ih_t = _prep_gates(lp["w_ih"].T, H, H_pad)                   # (in_l, 4H_pad)
        w_ih_t = jnp.pad(w_ih_t, ((0, in_pad - in_l), (0, 0)))
        w_hh_t = _prep_gates(lp["w_hh"].T, H, H_pad)                   # (H, 4H_pad)
        w_hh_t = jnp.pad(w_hh_t, ((0, H_pad - H), (0, 0)))
        bias = _prep_gates((lp["b_ih"] + lp["b_hh"])[None, :], H, H_pad)
        layers.append(dict(w_ih_t=w_ih_t.astype(jnp.bfloat16),
                           w_hh_t=w_hh_t.astype(jnp.bfloat16),
                           bias=bias.astype(jnp.float32)))
    w_fc_t = jnp.pad(raw["fc"]["w"].T,
                     ((0, H_pad - H), (0, C_pad - C))).astype(jnp.bfloat16)
    b_fc = jnp.pad(raw["fc"]["b"], (0, C_pad - C))[None, :].astype(jnp.float32)
    return {"layers": layers,
            "fc": {"w_fc_t": w_fc_t, "b_fc": b_fc},
            "dims": dict(input_size=I, hidden_size=H, num_classes=C,
                         I_pad=I_pad, H_pad=H_pad, C_pad=C_pad)}


# ----------------------------------------------------------------------------
# Forward pass (matches LSTMModel: out, _ = lstm(x); fc(out[:, -1, :]))
# ----------------------------------------------------------------------------
def lstm_model_forward(params, x_bti):
    dims = params["dims"]
    B, T, I = x_bti.shape
    I_pad, H_pad, C_pad = dims["I_pad"], dims["H_pad"], dims["C_pad"]
    B_pad = _round_up(max(B, 16), 16)

    # Batch block: give v7x's 2 TensorCores an independent parallel axis when
    # there is enough batch (no effect on v5e/v6e); keep blocks multiples of 16.
    tb = B_pad // 2 if (B_pad >= 32 and B_pad % 32 == 0) else B_pad

    vmem_limit = _vmem_limit_bytes()
    ts = _choose_ts(T, tb, max(I_pad, H_pad), 4 * H_pad, H_pad, vmem_limit)
    T_pad = _round_up(T, ts)

    # batch_first -> time-major; pad batch (sublanes), features (lanes), time.
    x = jnp.transpose(x_bti.astype(jnp.float32), (1, 0, 2))          # (T, B, I)
    x = jnp.pad(x, ((0, T_pad - T), (0, B_pad - B), (0, I_pad - I)))
    x = x.astype(jnp.bfloat16)                                       # (T_pad, B_pad, I_pad)

    num_layers = len(params["layers"])
    logits = None
    for l, lp in enumerate(params["layers"]):
        if l + 1 < num_layers:
            x = lstm_hidden_layer(x, lp["w_ih_t"], lp["bias"], lp["w_hh_t"],
                                  ts=ts, tb=tb, seq_len=T, vmem_limit=vmem_limit)
        else:
            logits = lstm_final_layer(x, lp["w_ih_t"], lp["bias"], lp["w_hh_t"],
                                      params["fc"]["w_fc_t"], params["fc"]["b_fc"],
                                      ts=ts, tb=tb, seq_len=T, vmem_limit=vmem_limit)
    return logits[:B, :dims["num_classes"]]


# ----------------------------------------------------------------------------
# Pure-JAX f32 reference (PyTorch semantics, unpadded, torch gate order)
# ----------------------------------------------------------------------------
def reference_forward(raw, x_bti):
    x = jnp.transpose(x_bti.astype(jnp.float32), (1, 0, 2))
    T, B, _ = x.shape
    for lp in raw["lstm"]:
        H = lp["w_hh"].shape[1]
        h = jnp.zeros((B, H), jnp.float32)
        c = jnp.zeros((B, H), jnp.float32)
        w_ih_t, w_hh_t = lp["w_ih"].T, lp["w_hh"].T
        bias = (lp["b_ih"] + lp["b_hh"])[None, :]
        outs = []
        for t in range(T):
            gates = x[t] @ w_ih_t + h @ w_hh_t + bias
            i = jax.nn.sigmoid(gates[:, 0 * H:1 * H])
            f = jax.nn.sigmoid(gates[:, 1 * H:2 * H])
            g = jnp.tanh(gates[:, 2 * H:3 * H])
            o = jax.nn.sigmoid(gates[:, 3 * H:4 * H])
            c = f * c + i * g
            h = o * jnp.tanh(c)
            outs.append(h)
        x = jnp.stack(outs, axis=0)
    return x[-1] @ raw["fc"]["w"].T + raw["fc"]["b"][None, :]


# ----------------------------------------------------------------------------
if __name__ == "__main__":
    batch, seq_len = 2, 8
    input_size, hidden_size, num_layers, num_classes = 16, 32, 2, 4

    key = jax.random.PRNGKey(0)
    key, xkey = jax.random.split(key)
    x = jax.random.normal(xkey, (batch, seq_len, input_size), jnp.float32)

    raw = init_raw_params(key, input_size, hidden_size, num_layers, num_classes)
    params = prepare_params(raw, input_size, hidden_size, num_classes)

    out = jax.block_until_ready(lstm_model_forward(params, x))
    ref = reference_forward(raw, x)

    assert out.shape == (batch, num_classes)
    max_err = float(jnp.max(jnp.abs(out - ref)))
    # bf16 MXU operands / bf16 h state (f32 accumulation, f32 c) vs f32 reference.
    assert jnp.allclose(out, ref, atol=5e-2, rtol=5e-2), f"mismatch vs reference (max |err|={max_err})"

    print("KERNEL_OK")
</pallas_src>

<mosaic_0001>
module attributes {stable_mosaic.version = 11 : i64} {
  func.func @_hidden_kernel(%arg0: i32, %arg1: i32, %arg2: memref<8x16x128xbf16, #tpu.memory_space<vmem>>, %arg3: memref<128x512xbf16, #tpu.memory_space<vmem>>, %arg4: memref<1x512xf32, #tpu.memory_space<vmem>>, %arg5: memref<128x512xbf16, #tpu.memory_space<vmem>>, %arg6: memref<8x16x128xbf16, #tpu.memory_space<vmem>>, %arg7: memref<128x512xf32, #tpu.memory_space<vmem>>, %arg8: memref<16x128xbf16, #tpu.memory_space<vmem>>, %arg9: memref<16x128xf32, #tpu.memory_space<vmem>>) attributes {dimension_semantics = [#tpu.dimension_semantics<parallel>, #tpu.dimension_semantics<arbitrary>], iteration_bounds = array<i64: 1, 1>, scalar_prefetch = 0 : i64, scratch_operands = 3 : i64, tpu.core_type = #tpu.core_type<tc>, window_params = [{transform_indices = @transform_0, window_bounds = array<i64: 8, 16, 128>}, {pipeline_mode = #tpu.pipeline_mode<synchronous>, transform_indices = @transform_1, window_bounds = array<i64: 128, 512>}, {pipeline_mode = #tpu.pipeline_mode<synchronous>, transform_indices = @transform_2, window_bounds = array<i64: 1, 512>}, {pipeline_mode = #tpu.pipeline_mode<synchronous>, transform_indices = @transform_3, window_bounds = array<i64: 128, 512>}, {transform_indices = @transform_4, window_bounds = array<i64: 8, 16, 128>}]} {
    %c0_i32 = arith.constant 0 : i32
    %0 = arith.cmpi eq, %arg1, %c0_i32 : i32
    %1 = arith.extui %0 : i1 to i32
    %c0_i32_0 = arith.constant 0 : i32
    %2 = arith.cmpi ne, %1, %c0_i32_0 : i32
    scf.if %2 {
      %cst_137 = arith.constant 0.000000e+00 : bf16
      %267 = vector.broadcast %cst_137 : bf16 to vector<16x128xbf16>
      %c0_138 = arith.constant 0 : index
      %c0_139 = arith.constant 0 : index
      %268 = vector.load %arg8[%c0_138, %c0_139] : memref<16x128xbf16, #tpu.memory_space<vmem>>, vector<16x128xbf16>
      tpu.vector_store %arg8[%c0_138, %c0_139], %267 {strides = array<i32>} : memref<16x128xbf16, #tpu.memory_space<vmem>>, vector<16x128xbf16>,
      %cst_140 = arith.constant 0.000000e+00 : f32
      %269 = vector.broadcast %cst_140 : f32 to vector<16x128xf32>
      %c0_141 = arith.constant 0 : index
      %c0_142 = arith.constant 0 : index
      %270 = vector.load %arg9[%c0_141, %c0_142] : memref<16x128xf32, #tpu.memory_space<vmem>>, vector<16x128xf32>
      tpu.vector_store %arg9[%c0_141, %c0_142], %269 {strides = array<i32>} : memref<16x128xf32, #tpu.memory_space<vmem>>, vector<16x128xf32>,
    } else {
    }
    %c0 = arith.constant 0 : index
    %c0_1 = arith.constant 0 : index
    %c0_2 = arith.constant 0 : index
    %3 = vector.load %arg2[%c0, %c0_1, %c0_2] : memref<8x16x128xbf16, #tpu.memory_space<vmem>>, vector<8x16x128xbf16>
    %4 = vector.shape_cast %3 : vector<8x16x128xbf16> to vector<128x128xbf16>
    %c0_3 = arith.constant 0 : index
    %c0_4 = arith.constant 0 : index
    %5 = vector.load %arg3[%c0_3, %c0_4] : memref<128x512xbf16, #tpu.memory_space<vmem>>, vector<128x512xbf16>
    %cst = arith.constant dense<0.000000e+00> : vector<128x512xf32>
    %6 = tpu.matmul %4, %5, %cst {dimension_numbers = #tpu.dot_dimension_numbers<[1], [0], [0], [1], [0, 0, 1, 1], [], []>} : vector<128x128xbf16>, vector<128x512xbf16>, vector<128x512xf32> -> vector<128x512xf32>
    %c0_5 = arith.constant 0 : index
    %c0_6 = arith.constant 0 : index
    %7 = vector.load %arg4[%c0_5, %c0_6] : memref<1x512xf32, #tpu.memory_space<vmem>>, vector<1x512xf32>
    %8 = vector.broadcast %7 : vector<1x512xf32> to vector<128x512xf32>
    %9 = arith.addf %6, %8 : vector<128x512xf32>
    %c0_7 = arith.constant 0 : index
    %c0_8 = arith.constant 0 : index
    %10 = vector.load %arg7[%c0_7, %c0_8] : memref<128x512xf32, #tpu.memory_space<vmem>>, vector<128x512xf32>
    tpu.vector_store %arg7[%c0_7, %c0_8], %9 {strides = array<i32>} : memref<128x512xf32, #tpu.memory_space<vmem>>, vector<128x512xf32>,
    %c0_i32_9 = arith.constant 0 : i32
    %c0_10 = arith.constant 0 : index
    %c0_11 = arith.constant 0 : index
    %11 = vector.load %arg8[%c0_10, %c0_11] : memref<16x128xbf16, #tpu.memory_space<vmem>>, vector<16x128xbf16>
    %c0_12 = arith.constant 0 : index
    %c0_13 = arith.constant 0 : index
    %12 = vector.load %arg9[%c0_12, %c0_13] : memref<16x128xf32, #tpu.memory_space<vmem>>, vector<16x128xf32>
    %c16_i32 = arith.constant 16 : i32
    %13 = arith.muli %c0_i32_9, %c16_i32 : i32
    %14 = tpu.assume_multiple %13, 16 : i32
    %15 = arith.index_cast %14 : i32 to index
    %c0_14 = arith.constant 0 : index
    %16 = vector.load %arg7[%15, %c0_14] : memref<128x512xf32, #tpu.memory_space<vmem>>, vector<16x512xf32>
    %c0_15 = arith.constant 0 : index
    %c0_16 = arith.constant 0 : index
    %17 = vector.load %arg5[%c0_15, %c0_16] : memref<128x512xbf16, #tpu.memory_space<vmem>>, vector<128x512xbf16>
    %cst_17 = arith.constant dense<0.000000e+00> : vector<16x512xf32>
    %18 = tpu.matmul %11, %17, %cst_17 {dimension_numbers = #tpu.dot_dimension_numbers<[1], [0], [0], [1], [0, 0, 1, 1], [], []>} : vector<16x128xbf16>, vector<128x512xbf16>, vector<16x512xf32> -> vector<16x512xf32>
    %19 = arith.addf %16, %18 : vector<16x512xf32>
    %20 = vector.extract_strided_slice %19 {offsets = [0, 0], sizes = [16, 384], strides = [1, 1]} : vector<16x512xf32> to vector<16x384xf32>
    %21 = arith.negf %20 : vector<16x384xf32>
    %22 = math.exp %21 : vector<16x384xf32>
    %cst_18 = arith.constant 1.000000e+00 : f32
    %23 = vector.broadcast %cst_18 : f32 to vector<16x384xf32>
    %24 = arith.addf %23, %22 : vector<16x384xf32>
    %25 = arith.divf %23, %24 : vector<16x384xf32>
    %26 = vector.extract_strided_slice %25 {offsets = [0, 0], sizes = [16, 128], strides = [1, 1]} : vector<16x384xf32> to vector<16x128xf32>
    %27 = vector.extract_strided_slice %25 {offsets = [0, 128], sizes = [16, 128], strides = [1, 1]} : vector<16x384xf32> to vector<16x128xf32>
    %28 = vector.extract_strided_slice %25 {offsets = [0, 256], sizes = [16, 128], strides = [1, 1]} : vector<16x384xf32> to vector<16x128xf32>
    %29 = vector.extract_strided_slice %19 {offsets = [0, 384], sizes = [16, 128], strides = [1, 1]} : vector<16x512xf32> to vector<16x128xf32>
    %30 = math.tanh %29 : vector<16x128xf32>
    %31 = arith.mulf %27, %12 : vector<16x128xf32>
    %32 = arith.mulf %26, %30 : vector<16x128xf32>
    %33 = arith.addf %31, %32 : vector<16x128xf32>
    %34 = math.tanh %33 : vector<16x128xf32>
    %35 = arith.mulf %28, %34 : vector<16x128xf32>
    %36 = arith.truncf %35 : vector<16x128xf32> to vector<16x128xbf16>
    %c0_19 = arith.constant 0 : index
    %c0_20 = arith.constant 0 : index
    %37 = vector.load %arg9[%c0_19, %c0_20] : memref<16x128xf32, #tpu.memory_space<vmem>>, vector<16x128xf32>
    tpu.vector_store %arg9[%c0_19, %c0_20], %33 {strides = array<i32>} : memref<16x128xf32, #tpu.memory_space<vmem>>, vector<16x128xf32>,
    %c0_21 = arith.constant 0 : index
    %c0_22 = arith.constant 0 : index
    %38 = vector.load %arg8[%c0_21, %c0_22] : memref<16x128xbf16, #tpu.memory_space<vmem>>, vector<16x128xbf16>
    tpu.vector_store %arg8[%c0_21, %c0_22], %36 {strides = array<i32>} : memref<16x128xbf16, #tpu.memory_space<vmem>>, vector<16x128xbf16>,
    %39 = arith.index_cast %c0_i32_9 : i32 to index
    %c0_23 = arith.constant 0 : index
    %c0_24 = arith.constant 0 : index
    %40 = vector.load %arg6[%39, %c0_23, %c0_24] : memref<8x16x128xbf16, #tpu.memory_space<vmem>>, vector<1x16x128xbf16>
    %41 = vector.shape_cast %40 : vector<1x16x128xbf16> to vector<16x128xbf16>
    %42 = vector.shape_cast %36 : vector<16x128xbf16> to vector<1x16x128xbf16>
    tpu.vector_store %arg6[%39, %c0_23, %c0_24], %42 {strides = array<i32>} : memref<8x16x128xbf16, #tpu.memory_space<vmem>>, vector<1x16x128xbf16>,
    %c1_i32 = arith.constant 1 : i32
    %c0_25 = arith.constant 0 : index
    %c0_26 = arith.constant 0 : index
    %43 = vector.load %arg8[%c0_25, %c0_26] : memref<16x128xbf16, #tpu.memory_space<vmem>>, vector<16x128xbf16>
    %c0_27 = arith.constant 0 : index
    %c0_28 = arith.constant 0 : index
    %44 = vector.load %arg9[%c0_27, %c0_28] : memref<16x128xf32, #tpu.memory_space<vmem>>, vector<16x128xf32>
    %c16_i32_29 = arith.constant 16 : i32
    %45 = arith.muli %c1_i32, %c16_i32_29 : i32
    %46 = tpu.assume_multiple %45, 16 : i32
    %47 = arith.index_cast %46 : i32 to index
    %c0_30 = arith.constant 0 : index
    %48 = vector.load %arg7[%47, %c0_30] : memref<128x512xf32, #tpu.memory_space<vmem>>, vector<16x512xf32>
    %c0_31 = arith.constant 0 : index
    %c0_32 = arith.constant 0 : index
    %49 = vector.load %arg5[%c0_31, %c0_32] : memref<128x512xbf16, #tpu.memory_space<vmem>>, vector<128x512xbf16>
    %cst_33 = arith.constant dense<0.000000e+00> : vector<16x512xf32>
    %50 = tpu.matmul %43, %49, %cst_33 {dimension_numbers = #tpu.dot_dimension_numbers<[1], [0], [0], [1], [0, 0, 1, 1], [], []>} : vector<16x128xbf16>, vector<128x512xbf16>, vector<16x512xf32> -> vector<16x512xf32>
    %51 = arith.addf %48, %50 : vector<16x512xf32>
    %52 = vector.extract_strided_slice %51 {offsets = [0, 0], sizes = [16, 384], strides = [1, 1]} : vector<16x512xf32> to vector<16x384xf32>
    %53 = arith.negf %52 : vector<16x384xf32>
    %54 = math.exp %53 : vector<16x384xf32>
    %cst_34 = arith.constant 1.000000e+00 : f32
    %55 = vector.broadcast %cst_34 : f32 to vector<16x384xf32>
    %56 = arith.addf %55, %54 : vector<16x384xf32>
    %57 = arith.divf %55, %56 : vector<16x384xf32>
    %58 = vector.extract_strided_slice %57 {offsets = [0, 0], sizes = [16, 128], strides = [1, 1]} : vector<16x384xf32> to vector<16x128xf32>
    %59 = vector.extract_strided_slice %57 {offsets = [0, 128], sizes = [16, 128], strides = [1, 1]} : vector<16x384xf32> to vector<16x128xf32>
    %60 = vector.extract_strided_slice %57 {offsets = [0, 256], sizes = [16, 128], strides = [1, 1]} : vector<16x384xf32> to vector<16x128xf32>
    %61 = vector.extract_strided_slice %51 {offsets = [0, 384], sizes = [16, 128], strides = [1, 1]} : vector<16x512xf32> to vector<16x128xf32>
    %62 = math.tanh %61 : vector<16x128xf32>
    %63 = arith.mulf %59, %44 : vector<16x128xf32>
    %64 = arith.mulf %58, %62 : vector<16x128xf32>
    %65 = arith.addf %63, %64 : vector<16x128xf32>
    %66 = math.tanh %65 : vector<16x128xf32>
    %67 = arith.mulf %60, %66 : vector<16x128xf32>
    %68 = arith.truncf %67 : vector<16x128xf32> to vector<16x128xbf16>
    %c0_35 = arith.constant 0 : index
    %c0_36 = arith.constant 0 : index
    %69 = vector.load %arg9[%c0_35, %c0_36] : memref<16x128xf32, #tpu.memory_space<vmem>>, vector<16x128xf32>
    tpu.vector_store %arg9[%c0_35, %c0_36], %65 {strides = array<i32>} : memref<16x128xf32, #tpu.memory_space<vmem>>, vector<16x128xf32>,
    %c0_37 = arith.constant 0 : index
    %c0_38 = arith.constant 0 : index
    %70 = vector.load %arg8[%c0_37, %c0_38] : memref<16x128xbf16, #tpu.memory_space<vmem>>, vector<16x128xbf16>
    tpu.vector_store %arg8[%c0_37, %c0_38], %68 {strides = array<i32>} : memref<16x128xbf16, #tpu.memory_space<vmem>>, vector<16x128xbf16>,
    %71 = arith.index_cast %c1_i32 : i32 to index
    %c0_39 = arith.constant 0 : index
    %c0_40 = arith.constant 0 : index
    %72 = vector.load %arg6[%71, %c0_39, %c0_40] : memref<8x16x128xbf16, #tpu.memory_space<vmem>>, vector<1x16x128xbf16>
    %73 = vector.shape_cast %72 : vector<1x16x128xbf16> to vector<16x128xbf16>
    %74 = vector.shape_cast %68 : vector<16x128xbf16> to vector<1x16x128xbf16>
    tpu.vector_store %arg6[%71, %c0_39, %c0_40], %74 {strides = array<i32>} : memref<8x16x128xbf16, #tpu.memory_space<vmem>>, vector<1x16x128xbf16>,
    %c2_i32 = arith.constant 2 : i32
    %c0_41 = arith.constant 0 : index
    %c0_42 = arith.constant 0 : index
    %75 = vector.load %arg8[%c0_41, %c0_42] : memref<16x128xbf16, #tpu.memory_space<vmem>>, vector<16x128xbf16>
    %c0_43 = arith.constant 0 : index
    %c0_44 = arith.constant 0 : index
    %76 = vector.load %arg9[%c0_43, %c0_44] : memref<16x128xf32, #tpu.memory_space<vmem>>, vector<16x128xf32>
    %c16_i32_45 = arith.constant 16 : i32
    %77 = arith.muli %c2_i32, %c16_i32_45 : i32
    %78 = tpu.assume_multiple %77, 16 : i32
    %79 = arith.index_cast %78 : i32 to index
    %c0_46 = arith.constant 0 : index
    %80 = vector.load %arg7[%79, %c0_46] : memref<128x512xf32, #tpu.memory_space<vmem>>, vector<16x512xf32>
    %c0_47 = arith.constant 0 : index
    %c0_48 = arith.constant 0 : index
    %81 = vector.load %arg5[%c0_47, %c0_48] : memref<128x512xbf16, #tpu.memory_space<vmem>>, vector<128x512xbf16>
    %cst_49 = arith.constant dense<0.000000e+00> : vector<16x512xf32>
    %82 = tpu.matmul %75, %81, %cst_49 {dimension_numbers = #tpu.dot_dimension_numbers<[1], [0], [0], [1], [0, 0, 1, 1], [], []>} : vector<16x128xbf16>, vector<128x512xbf16>, vector<16x512xf32> -> vector<16x512xf32>
    %83 = arith.addf %80, %82 : vector<16x512xf32>
    %84 = vector.extract_strided_slice %83 {offsets = [0, 0], sizes = [16, 384], strides = [1, 1]} : vector<16x512xf32> to vector<16x384xf32>
    %85 = arith.negf %84 : vector<16x384xf32>
    %86 = math.exp %85 : vector<16x384xf32>
    %cst_50 = arith.constant 1.000000e+00 : f32
    %87 = vector.broadcast %cst_50 : f32 to vector<16x384xf32>
    %88 = arith.addf %87, %86 : vector<16x384xf32>
    %89 = arith.divf %87, %88 : vector<16x384xf32>
    %90 = vector.extract_strided_slice %89 {offsets = [0, 0], sizes = [16, 128], strides = [1, 1]} : vector<16x384xf32> to vector<16x128xf32>
    %91 = vector.extract_strided_slice %89 {offsets = [0, 128], sizes = [16, 128], strides = [1, 1]} : vector<16x384xf32> to vector<16x128xf32>
    %92 = vector.extract_strided_slice %89 {offsets = [0, 256], sizes = [16, 128], strides = [1, 1]} : vector<16x384xf32> to vector<16x128xf32>
    %93 = vector.extract_strided_slice %83 {offsets = [0, 384], sizes = [16, 128], strides = [1, 1]} : vector<16x512xf32> to vector<16x128xf32>
    %94 = math.tanh %93 : vector<16x128xf32>
    %95 = arith.mulf %91, %76 : vector<16x128xf32>
    %96 = arith.mulf %90, %94 : vector<16x128xf32>
    %97 = arith.addf %95, %96 : vector<16x128xf32>
    %98 = math.tanh %97 : vector<16x128xf32>
    %99 = arith.mulf %92, %98 : vector<16x128xf32>
    %100 = arith.truncf %99 : vector<16x128xf32> to vector<16x128xbf16>
    %c0_51 = arith.constant 0 : index
    %c0_52 = arith.constant 0 : index
    %101 = vector.load %arg9[%c0_51, %c0_52] : memref<16x128xf32, #tpu.memory_space<vmem>>, vector<16x128xf32>
    tpu.vector_store %arg9[%c0_51, %c0_52], %97 {strides = array<i32>} : memref<16x128xf32, #tpu.memory_space<vmem>>, vector<16x128xf32>,
    %c0_53 = arith.constant 0 : index
    %c0_54 = arith.constant 0 : index
    %102 = vector.load %arg8[%c0_53, %c0_54] : memref<16x128xbf16, #tpu.memory_space<vmem>>, vector<16x128xbf16>
    tpu.vector_store %arg8[%c0_53, %c0_54], %100 {strides = array<i32>} : memref<16x128xbf16, #tpu.memory_space<vmem>>, vector<16x128xbf16>,
    %103 = arith.index_cast %c2_i32 : i32 to index
    %c0_55 = arith.constant 0 : index
    %c0_56 = arith.constant 0 : index
    %104 = vector.load %arg6[%103, %c0_55, %c0_56] : memref<8x16x128xbf16, #tpu.memory_space<vmem>>, vector<1x16x128xbf16>
    %105 = vector.shape_cast %104 : vector<1x16x128xbf16> to vector<16x128xbf16>
    %106 = vector.shape_cast %100 : vector<16x128xbf16> to vector<1x16x128xbf16>
    tpu.vector_store %arg6[%103, %c0_55, %c0_56], %106 {strides = array<i32>} : memref<8x16x128xbf16, #tpu.memory_space<vmem>>, vector<1x16x128xbf16>,
    %c3_i32 = arith.constant 3 : i32
    %c0_57 = arith.constant 0 : index
    %c0_58 = arith.constant 0 : index
    %107 = vector.load %arg8[%c0_57, %c0_58] : memref<16x128xbf16, #tpu.memory_space<vmem>>, vector<16x128xbf16>
    %c0_59 = arith.constant 0 : index
    %c0_60 = arith.constant 0 : index
    %108 = vector.load %arg9[%c0_59, %c0_60] : memref<16x128xf32, #tpu.memory_space<vmem>>, vector<16x128xf32>
    %c16_i32_61 = arith.constant 16 : i32
    %109 = arith.muli %c3_i32, %c16_i32_61 : i32
    %110 = tpu.assume_multiple %109, 16 : i32
    %111 = arith.index_cast %110 : i32 to index
    %c0_62 = arith.constant 0 : index
    %112 = vector.load %arg7[%111, %c0_62] : memref<128x512xf32, #tpu.memory_space<vmem>>, vector<16x512xf32>
    %c0_63 = arith.constant 0 : index
    %c0_64 = arith.constant 0 : index
    %113 = vector.load %arg5[%c0_63, %c0_64] : memref<128x512xbf16, #tpu.memory_space<vmem>>, vector<128x512xbf16>
    %cst_65 = arith.constant dense<0.000000e+00> : vector<16x512xf32>
    %114 = tpu.matmul %107, %113, %cst_65 {dimension_numbers = #tpu.dot_dimension_numbers<[1], [0], [0], [1], [0, 0, 1, 1], [], []>} : vector<16x128xbf16>, vector<128x512xbf16>, vector<16x512xf32> -> vector<16x512xf32>
    %115 = arith.addf %112, %114 : vector<16x512xf32>
    %116 = vector.extract_strided_slice %115 {offsets = [0, 0], sizes = [16, 384], strides = [1, 1]} : vector<16x512xf32> to vector<16x384xf32>
    %117 = arith.negf %116 : vector<16x384xf32>
    %118 = math.exp %117 : vector<16x384xf32>
    %cst_66 = arith.constant 1.000000e+00 : f32
    %119 = vector.broadcast %cst_66 : f32 to vector<16x384xf32>
    %120 = arith.addf %119, %118 : vector<16x384xf32>
    %121 = arith.divf %119, %120 : vector<16x384xf32>
    %122 = vector.extract_strided_slice %121 {offsets = [0, 0], sizes = [16, 128], strides = [1, 1]} : vector<16x384xf32> to vector<16x128xf32>
    %123 = vector.extract_strided_slice %121 {offsets = [0, 128], sizes = [16, 128], strides = [1, 1]} : vector<16x384xf32> to vector<16x128xf32>
    %124 = vector.extract_strided_slice %121 {offsets = [0, 256], sizes = [16, 128], strides = [1, 1]} : vector<16x384xf32> to vector<16x128xf32>
    %125 = vector.extract_strided_slice %115 {offsets = [0, 384], sizes = [16, 128], strides = [1, 1]} : vector<16x512xf32> to vector<16x128xf32>
    %126 = math.tanh %125 : vector<16x128xf32>
    %127 = arith.mulf %123, %108 : vector<16x128xf32>
    %128 = arith.mulf %122, %126 : vector<16x128xf32>
    %129 = arith.addf %127, %128 : vector<16x128xf32>
    %130 = math.tanh %129 : vector<16x128xf32>
    %131 = arith.mulf %124, %130 : vector<16x128xf32>
    %132 = arith.truncf %131 : vector<16x128xf32> to vector<16x128xbf16>
    %c0_67 = arith.constant 0 : index
    %c0_68 = arith.constant 0 : index
    %133 = vector.load %arg9[%c0_67, %c0_68] : memref<16x128xf32, #tpu.memory_space<vmem>>, vector<16x128xf32>
    tpu.vector_store %arg9[%c0_67, %c0_68], %129 {strides = array<i32>} : memref<16x128xf32, #tpu.memory_space<vmem>>, vector<16x128xf32>,
    %c0_69 = arith.constant 0 : index
    %c0_70 = arith.constant 0 : index
    %134 = vector.load %arg8[%c0_69, %c0_70] : memref<16x128xbf16, #tpu.memory_space<vmem>>, vector<16x128xbf16>
    tpu.vector_store %arg8[%c0_69, %c0_70], %132 {strides = array<i32>} : memref<16x128xbf16, #tpu.memory_space<vmem>>, vector<16x128xbf16>,
    %135 = arith.index_cast %c3_i32 : i32 to index
    %c0_71 = arith.constant 0 : index
    %c0_72 = arith.constant 0 : index
    %136 = vector.load %arg6[%135, %c0_71, %c0_72] : memref<8x16x128xbf16, #tpu.memory_space<vmem>>, vector<1x16x128xbf16>
    %137 = vector.shape_cast %136 : vector<1x16x128xbf16> to vector<16x128xbf16>
    %138 = vector.shape_cast %132 : vector<16x128xbf16> to vector<1x16x128xbf16>
    tpu.vector_store %arg6[%135, %c0_71, %c0_72], %138 {strides = array<i32>} : memref<8x16x128xbf16, #tpu.memory_space<vmem>>, vector<1x16x128xbf16>,
    %c4_i32 = arith.constant 4 : i32
    %c0_73 = arith.constant 0 : index
    %c0_74 = arith.constant 0 : index
    %139 = vector.load %arg8[%c0_73, %c0_74] : memref<16x128xbf16, #tpu.memory_space<vmem>>, vector<16x128xbf16>
    %c0_75 = arith.constant 0 : index
    %c0_76 = arith.constant 0 : index
    %140 = vector.load %arg9[%c0_75, %c0_76] : memref<16x128xf32, #tpu.memory_space<vmem>>, vector<16x128xf32>
    %c16_i32_77 = arith.constant 16 : i32
    %141 = arith.muli %c4_i32, %c16_i32_77 : i32
    %142 = tpu.assume_multiple %141, 16 : i32
    %143 = arith.index_cast %142 : i32 to index
    %c0_78 = arith.constant 0 : index
    %144 = vector.load %arg7[%143, %c0_78] : memref<128x512xf32, #tpu.memory_space<vmem>>, vector<16x512xf32>
    %c0_79 = arith.constant 0 : index
    %c0_80 = arith.constant 0 : index
    %145 = vector.load %arg5[%c0_79, %c0_80] : memref<128x512xbf16, #tpu.memory_space<vmem>>, vector<128x512xbf16>
    %cst_81 = arith.constant dense<0.000000e+00> : vector<16x512xf32>
    %146 = tpu.matmul %139, %145, %cst_81 {dimension_numbers = #tpu.dot_dimension_numbers<[1], [0], [0], [1], [0, 0, 1, 1], [], []>} : vector<16x128xbf16>, vector<128x512xbf16>, vector<16x512xf32> -> vector<16x512xf32>
    %147 = arith.addf %144, %146 : vector<16x512xf32>
    %148 = vector.extract_strided_slice %147 {offsets = [0, 0], sizes = [16, 384], strides = [1, 1]} : vector<16x512xf32> to vector<16x384xf32>
    %149 = arith.negf %148 : vector<16x384xf32>
    %150 = math.exp %149 : vector<16x384xf32>
    %cst_82 = arith.constant 1.000000e+00 : f32
    %151 = vector.broadcast %cst_82 : f32 to vector<16x384xf32>
    %152 = arith.addf %151, %150 : vector<16x384xf32>
    %153 = arith.divf %151, %152 : vector<16x384xf32>
    %154 = vector.extract_strided_slice %153 {offsets = [0, 0], sizes = [16, 128], strides = [1, 1]} : vector<16x384xf32> to vector<16x128xf32>
    %155 = vector.extract_strided_slice %153 {offsets = [0, 128], sizes = [16, 128], strides = [1, 1]} : vector<16x384xf32> to vector<16x128xf32>
    %156 = vector.extract_strided_slice %153 {offsets = [0, 256], sizes = [16, 128], strides = [1, 1]} : vector<16x384xf32> to vector<16x128xf32>
    %157 = vector.extract_strided_slice %147 {offsets = [0, 384], sizes = [16, 128], strides = [1, 1]} : vector<16x512xf32> to vector<16x128xf32>
    %158 = math.tanh %157 : vector<16x128xf32>
    %159 = arith.mulf %155, %140 : vector<16x128xf32>
    %160 = arith.mulf %154, %158 : vector<16x128xf32>
    %161 = arith.addf %159, %160 : vector<16x128xf32>
    %162 = math.tanh %161 : vector<16x128xf32>
    %163 = arith.mulf %156, %162 : vector<16x128xf32>
    %164 = arith.truncf %163 : vector<16x128xf32> to vector<16x128xbf16>
    %c0_83 = arith.constant 0 : index
    %c0_84 = arith.constant 0 : index
    %165 = vector.load %arg9[%c0_83, %c0_84] : memref<16x128xf32, #tpu.memory_space<vmem>>, vector<16x128xf32>
    tpu.vector_store %arg9[%c0_83, %c0_84], %161 {strides = array<i32>} : memref<16x128xf32, #tpu.memory_space<vmem>>, vector<16x128xf32>,
    %c0_85 = arith.constant 0 : index
    %c0_86 = arith.constant 0 : index
    %166 = vector.load %arg8[%c0_85, %c0_86] : memref<16x128xbf16, #tpu.memory_space<vmem>>, vector<16x128xbf16>
    tpu.vector_store %arg8[%c0_85, %c0_86], %164 {strides = array<i32>} : memref<16x128xbf16, #tpu.memory_space<vmem>>, vector<16x128xbf16>,
    %167 = arith.index_cast %c4_i32 : i32 to index
    %c0_87 = arith.constant 0 : index
    %c0_88 = arith.constant 0 : index
    %168 = vector.load %arg6[%167, %c0_87, %c0_88] : memref<8x16x128xbf16, #tpu.memory_space<vmem>>, vector<1x16x128xbf16>
    %169 = vector.shape_cast %168 : vector<1x16x128xbf16> to vector<16x128xbf16>
    %170 = vector.shape_cast %164 : vector<16x128xbf16> to vector<1x16x128xbf16>
    tpu.vector_store %arg6[%167, %c0_87, %c0_88], %170 {strides = array<i32>} : memref<8x16x128xbf16, #tpu.memory_space<vmem>>, vector<1x16x128xbf16>,
    %c5_i32 = arith.constant 5 : i32
    %c0_89 = arith.constant 0 : index
    %c0_90 = arith.constant 0 : index
    %171 = vector.load %arg8[%c0_89, %c0_90] : memref<16x128xbf16, #tpu.memory_space<vmem>>, vector<16x128xbf16>
    %c0_91 = arith.constant 0 : index
    %c0_92 = arith.constant 0 : index
    %172 = vector.load %arg9[%c0_91, %c0_92] : memref<16x128xf32, #tpu.memory_space<vmem>>, vector<16x128xf32>
    %c16_i32_93 = arith.constant 16 : i32
    %173 = arith.muli %c5_i32, %c16_i32_93 : i32
    %174 = tpu.assume_multiple %173, 16 : i32
    %175 = arith.index_cast %174 : i32 to index
    %c0_94 = arith.constant 0 : index
    %176 = vector.load %arg7[%175, %c0_94] : memref<128x512xf32, #tpu.memory_space<vmem>>, vector<16x512xf32>
    %c0_95 = arith.constant 0 : index
    %c0_96 = arith.constant 0 : index
    %177 = vector.load %arg5[%c0_95, %c0_96] : memref<128x512xbf16, #tpu.memory_space<vmem>>, vector<128x512xbf16>
    %cst_97 = arith.constant dense<0.000000e+00> : vector<16x512xf32>
    %178 = tpu.matmul %171, %177, %cst_97 {dimension_numbers = #tpu.dot_dimension_numbers<[1], [0], [0], [1], [0, 0, 1, 1], [], []>} : vector<16x128xbf16>, vector<128x512xbf16>, vector<16x512xf32> -> vector<16x512xf32>
    %179 = arith.addf %176, %178 : vector<16x512xf32>
    %180 = vector.extract_strided_slice %179 {offsets = [0, 0], sizes = [16, 384], strides = [1, 1]} : vector<16x512xf32> to vector<16x384xf32>
    %181 = arith.negf %180 : vector<16x384xf32>
    %182 = math.exp %181 : vector<16x384xf32>
    %cst_98 = arith.constant 1.000000e+00 : f32
    %183 = vector.broadcast %cst_98 : f32 to vector<16x384xf32>
    %184 = arith.addf %183, %182 : vector<16x384xf32>
    %185 = arith.divf %183, %184 : vector<16x384xf32>
    %186 = vector.extract_strided_slice %185 {offsets = [0, 0], sizes = [16, 128], strides = [1, 1]} : vector<16x384xf32> to vector<16x128xf32>
    %187 = vector.extract_strided_slice %185 {offsets = [0, 128], sizes = [16, 128], strides = [1, 1]} : vector<16x384xf32> to vector<16x128xf32>
    %188 = vector.extract_strided_slice %185 {offsets = [0, 256], sizes = [16, 128], strides = [1, 1]} : vector<16x384xf32> to vector<16x128xf32>
    %189 = vector.extract_strided_slice %179 {offsets = [0, 384], sizes = [16, 128], strides = [1, 1]} : vector<16x512xf32> to vector<16x128xf32>
    %190 = math.tanh %189 : vector<16x128xf32>
    %191 = arith.mulf %187, %172 : vector<16x128xf32>
    %192 = arith.mulf %186, %190 : vector<16x128xf32>
    %193 = arith.addf %191, %192 : vector<16x128xf32>
    %194 = math.tanh %193 : vector<16x128xf32>
    %195 = arith.mulf %188, %194 : vector<16x128xf32>
    %196 = arith.truncf %195 : vector<16x128xf32> to vector<16x128xbf16>
    %c0_99 = arith.constant 0 : index
    %c0_100 = arith.constant 0 : index
    %197 = vector.load %arg9[%c0_99, %c0_100] : memref<16x128xf32, #tpu.memory_space<vmem>>, vector<16x128xf32>
    tpu.vector_store %arg9[%c0_99, %c0_100], %193 {strides = array<i32>} : memref<16x128xf32, #tpu.memory_space<vmem>>, vector<16x128xf32>,
    %c0_101 = arith.constant 0 : index
    %c0_102 = arith.constant 0 : index
    %198 = vector.load %arg8[%c0_101, %c0_102] : memref<16x128xbf16, #tpu.memory_space<vmem>>, vector<16x128xbf16>
    tpu.vector_store %arg8[%c0_101, %c0_102], %196 {strides = array<i32>} : memref<16x128xbf16, #tpu.memory_space<vmem>>, vector<16x128xbf16>,
    %199 = arith.index_cast %c5_i32 : i32 to index
    %c0_103 = arith.constant 0 : index
    %c0_104 = arith.constant 0 : index
    %200 = vector.load %arg6[%199, %c0_103, %c0_104] : memref<8x16x128xbf16, #tpu.memory_space<vmem>>, vector<1x16x128xbf16>
    %201 = vector.shape_cast %200 : vector<1x16x128xbf16> to vector<16x128xbf16>
    %202 = vector.shape_cast %196 : vector<16x128xbf16> to vector<1x16x128xbf16>
    tpu.vector_store %arg6[%199, %c0_103, %c0_104], %202 {strides = array<i32>} : memref<8x16x128xbf16, #tpu.memory_space<vmem>>, vector<1x16x128xbf16>,
    %c6_i32 = arith.constant 6 : i32
    %c0_105 = arith.constant 0 : index
    %c0_106 = arith.constant 0 : index
    %203 = vector.load %arg8[%c0_105, %c0_106] : memref<16x128xbf16, #tpu.memory_space<vmem>>, vector<16x128xbf16>
    %c0_107 = arith.constant 0 : index
    %c0_108 = arith.constant 0 : index
    %204 = vector.load %arg9[%c0_107, %c0_108] : memref<16x128xf32, #tpu.memory_space<vmem>>, vector<16x128xf32>
    %c16_i32_109 = arith.constant 16 : i32
    %205 = arith.muli %c6_i32, %c16_i32_109 : i32
    %206 = tpu.assume_multiple %205, 16 : i32
    %207 = arith.index_cast %206 : i32 to index
    %c0_110 = arith.constant 0 : index
    %208 = vector.load %arg7[%207, %c0_110] : memref<128x512xf32, #tpu.memory_space<vmem>>, vector<16x512xf32>
    %c0_111 = arith.constant 0 : index
    %c0_112 = arith.constant 0 : index
    %209 = vector.load %arg5[%c0_111, %c0_112] : memref<128x512xbf16, #tpu.memory_space<vmem>>, vector<128x512xbf16>
    %cst_113 = arith.constant dense<0.000000e+00> : vector<16x512xf32>
    %210 = tpu.matmul %203, %209, %cst_113 {dimension_numbers = #tpu.dot_dimension_numbers<[1], [0], [0], [1], [0, 0, 1, 1], [], []>} : vector<16x128xbf16>, vector<128x512xbf16>, vector<16x512xf32> -> vector<16x512xf32>
    %211 = arith.addf %208, %210 : vector<16x512xf32>
    %212 = vector.extract_strided_slice %211 {offsets = [0, 0], sizes = [16, 384], strides = [1, 1]} : vector<16x512xf32> to vector<16x384xf32>
    %213 = arith.negf %212 : vector<16x384xf32>
    %214 = math.exp %213 : vector<16x384xf32>
    %cst_114 = arith.constant 1.000000e+00 : f32
    %215 = vector.broadcast %cst_114 : f32 to vector<16x384xf32>
    %216 = arith.addf %215, %214 : vector<16x384xf32>
    %217 = arith.divf %215, %216 : vector<16x384xf32>
    %218 = vector.extract_strided_slice %217 {offsets = [0, 0], sizes = [16, 128], strides = [1, 1]} : vector<16x384xf32> to vector<16x128xf32>
    %219 = vector.extract_strided_slice %217 {offsets = [0, 128], sizes = [16, 128], strides = [1, 1]} : vector<16x384xf32> to vector<16x128xf32>
    %220 = vector.extract_strided_slice %217 {offsets = [0, 256], sizes = [16, 128], strides = [1, 1]} : vector<16x384xf32> to vector<16x128xf32>
    %221 = vector.extract_strided_slice %211 {offsets = [0, 384], sizes = [16, 128], strides = [1, 1]} : vector<16x512xf32> to vector<16x128xf32>
    %222 = math.tanh %221 : vector<16x128xf32>
    %223 = arith.mulf %219, %204 : vector<16x128xf32>
    %224 = arith.mulf %218, %222 : vector<16x128xf32>
    %225 = arith.addf %223, %224 : vector<16x128xf32>
    %226 = math.tanh %225 : vector<16x128xf32>
    %227 = arith.mulf %220, %226 : vector<16x128xf32>
    %228 = arith.truncf %227 : vector<16x128xf32> to vector<16x128xbf16>
    %c0_115 = arith.constant 0 : index
    %c0_116 = arith.constant 0 : index
    %229 = vector.load %arg9[%c0_115, %c0_116] : memref<16x128xf32, #tpu.memory_space<vmem>>, vector<16x128xf32>
    tpu.vector_store %arg9[%c0_115, %c0_116], %225 {strides = array<i32>} : memref<16x128xf32, #tpu.memory_space<vmem>>, vector<16x128xf32>,
    %c0_117 = arith.constant 0 : index
    %c0_118 = arith.constant 0 : index
    %230 = vector.load %arg8[%c0_117, %c0_118] : memref<16x128xbf16, #tpu.memory_space<vmem>>, vector<16x128xbf16>
    tpu.vector_store %arg8[%c0_117, %c0_118], %228 {strides = array<i32>} : memref<16x128xbf16, #tpu.memory_space<vmem>>, vector<16x128xbf16>,
    %231 = arith.index_cast %c6_i32 : i32 to index
    %c0_119 = arith.constant 0 : index
    %c0_120 = arith.constant 0 : index
    %232 = vector.load %arg6[%231, %c0_119, %c0_120] : memref<8x16x128xbf16, #tpu.memory_space<vmem>>, vector<1x16x128xbf16>
    %233 = vector.shape_cast %232 : vector<1x16x128xbf16> to vector<16x128xbf16>
    %234 = vector.shape_cast %228 : vector<16x128xbf16> to vector<1x16x128xbf16>
    tpu.vector_store %arg6[%231, %c0_119, %c0_120], %234 {strides = array<i32>} : memref<8x16x128xbf16, #tpu.memory_space<vmem>>, vector<1x16x128xbf16>,
    %c7_i32 = arith.constant 7 : i32
    %c0_121 = arith.constant 0 : index
    %c0_122 = arith.constant 0 : index
    %235 = vector.load %arg8[%c0_121, %c0_122] : memref<16x128xbf16, #tpu.memory_space<vmem>>, vector<16x128xbf16>
    %c0_123 = arith.constant 0 : index
    %c0_124 = arith.constant 0 : index
    %236 = vector.load %arg9[%c0_123, %c0_124] : memref<16x128xf32, #tpu.memory_space<vmem>>, vector<16x128xf32>
    %c16_i32_125 = arith.constant 16 : i32
    %237 = arith.muli %c7_i32, %c16_i32_125 : i32
    %238 = tpu.assume_multiple %237, 16 : i32
    %239 = arith.index_cast %238 : i32 to index
    %c0_126 = arith.constant 0 : index
    %240 = vector.load %arg7[%239, %c0_126] : memref<128x512xf32, #tpu.memory_space<vmem>>, vector<16x512xf32>
    %c0_127 = arith.constant 0 : index
    %c0_128 = arith.constant 0 : index
    %241 = vector.load %arg5[%c0_127, %c0_128] : memref<128x512xbf16, #tpu.memory_space<vmem>>, vector<128x512xbf16>
    %cst_129 = arith.constant dense<0.000000e+00> : vector<16x512xf32>
    %242 = tpu.matmul %235, %241, %cst_129 {dimension_numbers = #tpu.dot_dimension_numbers<[1], [0], [0], [1], [0, 0, 1, 1], [], []>} : vector<16x128xbf16>, vector<128x512xbf16>, vector<16x512xf32> -> vector<16x512xf32>
    %243 = arith.addf %240, %242 : vector<16x512xf32>
    %244 = vector.extract_strided_slice %243 {offsets = [0, 0], sizes = [16, 384], strides = [1, 1]} : vector<16x512xf32> to vector<16x384xf32>
    %245 = arith.negf %244 : vector<16x384xf32>
    %246 = math.exp %245 : vector<16x384xf32>
    %cst_130 = arith.constant 1.000000e+00 : f32
    %247 = vector.broadcast %cst_130 : f32 to vector<16x384xf32>
    %248 = arith.addf %247, %246 : vector<16x384xf32>
    %249 = arith.divf %247, %248 : vector<16x384xf32>
    %250 = vector.extract_strided_slice %249 {offsets = [0, 0], sizes = [16, 128], strides = [1, 1]} : vector<16x384xf32> to vector<16x128xf32>
    %251 = vector.extract_strided_slice %249 {offsets = [0, 128], sizes = [16, 128], strides = [1, 1]} : vector<16x384xf32> to vector<16x128xf32>
    %252 = vector.extract_strided_slice %249 {offsets = [0, 256], sizes = [16, 128], strides = [1, 1]} : vector<16x384xf32> to vector<16x128xf32>
    %253 = vector.extract_strided_slice %243 {offsets = [0, 384], sizes = [16, 128], strides = [1, 1]} : vector<16x512xf32> to vector<16x128xf32>
    %254 = math.tanh %253 : vector<16x128xf32>
    %255 = arith.mulf %251, %236 : vector<16x128xf32>
    %256 = arith.mulf %250, %254 : vector<16x128xf32>
    %257 = arith.addf %255, %256 : vector<16x128xf32>
    %258 = math.tanh %257 : vector<16x128xf32>
    %259 = arith.mulf %252, %258 : vector<16x128xf32>
    %260 = arith.truncf %259 : vector<16x128xf32> to vector<16x128xbf16>
    %c0_131 = arith.constant 0 : index
    %c0_132 = arith.constant 0 : index
    %261 = vector.load %arg9[%c0_131, %c0_132] : memref<16x128xf32, #tpu.memory_space<vmem>>, vector<16x128xf32>
    tpu.vector_store %arg9[%c0_131, %c0_132], %257 {strides = array<i32>} : memref<16x128xf32, #tpu.memory_space<vmem>>, vector<16x128xf32>,
    %c0_133 = arith.constant 0 : index
    %c0_134 = arith.constant 0 : index
    %262 = vector.load %arg8[%c0_133, %c0_134] : memref<16x128xbf16, #tpu.memory_space<vmem>>, vector<16x128xbf16>
    tpu.vector_store %arg8[%c0_133, %c0_134], %260 {strides = array<i32>} : memref<16x128xbf16, #tpu.memory_space<vmem>>, vector<16x128xbf16>,
    %263 = arith.index_cast %c7_i32 : i32 to index
    %c0_135 = arith.constant 0 : index
    %c0_136 = arith.constant 0 : index
    %264 = vector.load %arg6[%263, %c0_135, %c0_136] : memref<8x16x128xbf16, #tpu.memory_space<vmem>>, vector<1x16x128xbf16>
    %265 = vector.shape_cast %264 : vector<1x16x128xbf16> to vector<16x128xbf16>
    %266 = vector.shape_cast %260 : vector<16x128xbf16> to vector<1x16x128xbf16>
    tpu.vector_store %arg6[%263, %c0_135, %c0_136], %266 {strides = array<i32>} : memref<8x16x128xbf16, #tpu.memory_space<vmem>>, vector<1x16x128xbf16>,
    %c8_i32 = arith.constant 8 : i32
    return
  }
  func.func @transform_0(%arg0: i32, %arg1: i32) -> (i32, i32, i32) {
    %c0_i32 = arith.constant 0 : i32
    %c0_i32_0 = arith.constant 0 : i32
    return %arg1, %arg0, %c0_i32 : i32, i32, i32
  }
  func.func @transform_1(%arg0: i32, %arg1: i32) -> (i32, i32) {
    %c0_i32 = arith.constant 0 : i32
    %c0_i32_0 = arith.constant 0 : i32
    %c0_i32_1 = arith.constant 0 : i32
    return %c0_i32, %c0_i32_0 : i32, i32
  }
  func.func @transform_2(%arg0: i32, %arg1: i32) -> (i32, i32) {
    %c0_i32 = arith.constant 0 : i32
    %c0_i32_0 = arith.constant 0 : i32
    %c0_i32_1 = arith.constant 0 : i32
    return %c0_i32, %c0_i32_0 : i32, i32
  }
  func.func @transform_3(%arg0: i32, %arg1: i32) -> (i32, i32) {
    %c0_i32 = arith.constant 0 : i32
    %c0_i32_0 = arith.constant 0 : i32
    %c0_i32_1 = arith.constant 0 : i32
    return %c0_i32, %c0_i32_0 : i32, i32
  }
  func.func @transform_4(%arg0: i32, %arg1: i32) -> (i32, i32, i32) {
    %c0_i32 = arith.constant 0 : i32
    %c0_i32_0 = arith.constant 0 : i32
    return %arg1, %arg0, %c0_i32 : i32, i32, i32
  }
}

</mosaic_0001>

<bundles_post_ra>
// kernel: tpu_custom_call.1
= control target key start
LH: loop header
LB: loop body
LE: loop exit
PB: predicated region body
PF: predicated region fallthrough
CT: control target
= control target key end

     0   :  { %9 = vsyncpa [#allocation6], 0  ;;  %s5255_s0 = inlined_call_operand.hbm [shape: bf16[8,16,128], index: 0, kind: input, shape index: {}]   ;;  %s5256_s1 = inlined_call_operand.hbm [shape: bf16[128,512], index: 1, kind: input, shape index: {}]   ;;  %s5257_s2 = inlined_call_operand.vmem [shape: f32[1,512], index: 2, kind: input, shape index: {}]   ;;  %s5258_s3 = inlined_call_operand.hbm [shape: bf16[128,512], index: 3, kind: input, shape index: {}]   ;;  %s5259_s4 = inlined_call_operand.hbm [shape: bf16[8,16,128], index: 4, kind: output, shape index: {}]  }
   0x1   :  { %10 = vsyncpa [#allocation9], 0 }
   0x2   :  { %11 = vsyncpa [#allocation7], 0  ;;  %s4616_s15 = smov [#allocation8]   ;;  %s4522_s19 = scalar_lea.hbm %s5256_s1, 4096 }
   0x3   :  { %s29_s16 = sshll.u32 %s4616_s15, 4  ;;  %p4523_p0 = scmp.ne.s32.totalorder %s5256_s1, %s4522_s19  ;;  %s30_s16 = int_to_ptr.vmem [resolvable:$true] %s29_s16 }
   0x4   :  { %p4526_p1 = scmp.lt.u32.totalorder %s4522_s19, %s5256_s1 }
   0x6   :  { %p4528_p2 = pnand %p4526_p1, %p4523_p0 }
   0x8   :  { %4531 = shalt.err (!%p4528_p2)
}
   0x9   :  { %s4532_s24 = scalar_lea.vmem %s30_s16, 4096  ;;  %p4537_p4 = scmp.lt.s32.totalorder %s30_s16, %s30_s16 }
   0xa   :  { %p4533_p3 = scmp.ne.s32.totalorder %s30_s16, %s4532_s24  ;;  %p4538_p5 = scmp.lt.s32.totalorder %s4532_s24, %s4532_s24 }
   0xc   :  { %p4539_p6 = por %p4538_p5, %p4537_p4 }
   0xe   :  { %p4540_p7 = pnand %p4539_p6, %p4533_p3 }
  0x10   :  { %4543 = shalt.err (!%p4540_p7)
}
  0x11   :  { %s4617_s25 = smov 256   ;;  %s4618_s26 = smov 16  }
  0x12   :  { %35 = dma.hbm_to_vmem [thread:$0]  %s5256_s1, 4096, %s30_s16, [#allocation9], %s4617_s25, %s4617_s25, %s4618_s26  }
  0x13   :  { %s4619_s29 = smov [#allocation5]   ;;  %s4544_s7 = scalar_lea.hbm %s5255_s0, 1024 }
  0x14   :  { %s17_s30 = sshll.u32 %s4619_s29, 4  ;;  %p4545_p8 = scmp.ne.s32.totalorder %s5255_s0, %s4544_s7  ;;  %s18_s30 = int_to_ptr.vmem [resolvable:$true] %s17_s30 }
  0x15   :  { %p4548_p9 = scmp.lt.u32.totalorder %s4544_s7, %s5255_s0 }
  0x17   :  { %p4550_p10 = pnand %p4548_p9, %p4545_p8 }
  0x19   :  { %4553 = shalt.err (!%p4550_p10)
}
  0x1a   :  { %s4554_s12 = scalar_lea.vmem %s18_s30, 1024  ;;  %p4559_p12 = scmp.lt.s32.totalorder %s18_s30, %s18_s30 }
  0x1b   :  { %p4555_p11 = scmp.ne.s32.totalorder %s18_s30, %s4554_s12  ;;  %p4560_p13 = scmp.lt.s32.totalorder %s4554_s12, %s4554_s12 }
  0x1d   :  { %p4561_p0 = por %p4560_p13, %p4559_p12 }
  0x1f   :  { %p4562_p1 = pnand %p4561_p0, %p4555_p11 }
  0x21   :  { %4565 = shalt.err (!%p4562_p1)
}
  0x22   :  { %s4620_s1 = smov 64   ;;  %s4621_s13 = smov 4  }
  0x23   :  { %23 = dma.hbm_to_vmem [thread:$0]  %s5255_s0, 1024, %s18_s30, [#allocation6], %s4620_s1, %s4620_s1, %s4621_s13  }
  0x24   :  { %s4622_s16 = smov [#allocation10]   ;;  %s4566_s20 = scalar_lea.hbm %s5258_s3, 4096 }
  0x25   :  { %s43_s17 = sshll.u32 %s4622_s16, 4  ;;  %p4567_p2 = scmp.ne.s32.totalorder %s5258_s3, %s4566_s20  ;;  %s44_s17 = int_to_ptr.vmem [resolvable:$true] %s43_s17 }
  0x26   :  { %p4570_p3 = scmp.lt.u32.totalorder %s4566_s20, %s5258_s3 }
  0x28   :  { %p4572_p4 = pnand %p4570_p3, %p4567_p2 }
  0x2a   :  { %4575 = shalt.err (!%p4572_p4)
}
  0x2b   :  { %s4576_s27 = scalar_lea.vmem %s44_s17, 4096  ;;  %p4581_p6 = scmp.lt.s32.totalorder %s44_s17, %s44_s17 }
  0x2c   :  { %p4577_p5 = scmp.ne.s32.totalorder %s44_s17, %s4576_s27  ;;  %p4582_p7 = scmp.lt.s32.totalorder %s4576_s27, %s4576_s27 }
  0x2e   :  { %p4583_p8 = por %p4582_p7, %p4581_p6 }
  0x30   :  { %p4584_p9 = pnand %p4583_p8, %p4577_p5 }
  0x32   :  { %4587 = shalt.err (!%p4584_p9)
}
  0x33   :  { %49 = dma.hbm_to_vmem [thread:$0]  %s5258_s3, 4096, %s44_s17, [#allocation9], %s4617_s25, %s4617_s25, %s4618_s26  }
  0x34   :  { %4610 = dma.done.wait [#allocation6], 1024  }
  0x35   :  { %4611 = vsyncadd [#allocation6], 4294966272 }
  0x36   :  { %4612 = dma.done.wait [#allocation9], 8192  }
  0x37   :  { %4613 = vsyncadd [#allocation9], 4294959104  ;;  %v4623_v0 = vmov 0   ;;  %v4108_v1 = vld [vmem:[#allocation8 + $0x4] ss:$16 sps:$4 sm:$0xff]   ;;  %v4160_v43 = vld [vmem:[#allocation5 + $0x8] sm:$0xff]  }
  0x38   :  { %377 = vmatprep.mubr.bf16.mxu0 %v4623_v0  ;;  %490 = vmatprep.mubr.bf16.mxu1 %v4623_v0  ;;  %v4110_v2 = vld [vmem:[#allocation8 + $0xc] ss:$16 sps:$4 sm:$0xff]   ;;  %v4112_v3 = vld [vmem:[#allocation8] ss:$16 sps:$4 sm:$0xff]   ;;  %v4113_v4 = vld [vmem:[#allocation8 + $0x8] ss:$16 sps:$4 sm:$0xff]  }
  0x39   :  { %345 = vmatprep.subr.bf16.mxu0 %v4108_v1  ;;  %458 = vmatprep.subr.bf16.mxu1 %v4110_v2  ;;  %v4114_v5 = vld [vmem:[#allocation8 + $0x24] ss:$16 sps:$4 sm:$0xff]   ;;  %v4116_v6 = vld [vmem:[#allocation8 + $0x2c] ss:$16 sps:$4 sm:$0xff]   ;;  %v4118_v7 = vld [vmem:[#allocation8 + $0x20] ss:$16 sps:$4 sm:$0xff]  }
  0x3a   :  { %346 = vmatpush1.bf16.msra.mxu0 %v4112_v3  ;;  %459 = vmatpush1.bf16.msra.mxu1 %v4113_v4  ;;  %v4119_v8 = vld [vmem:[#allocation8 + $0x28] ss:$16 sps:$4 sm:$0xff]   ;;  %v4120_v9 = vld [vmem:[#allocation8 + $0x44] ss:$16 sps:$4 sm:$0xff]   ;;  %v4122_v10 = vld [vmem:[#allocation8 + $0x4c] ss:$16 sps:$4 sm:$0xff]  }
  0x3b   :  { %347 = vmatprep.subr.bf16.mxu0 %v4114_v5  ;;  %460 = vmatprep.subr.bf16.mxu1 %v4116_v6  ;;  %v4124_v11 = vld [vmem:[#allocation8 + $0x40] ss:$16 sps:$4 sm:$0xff]   ;;  %v4125_v12 = vld [vmem:[#allocation8 + $0x48] ss:$16 sps:$4 sm:$0xff]   ;;  %v4126_v13 = vld [vmem:[#allocation8 + $0x64] ss:$16 sps:$4 sm:$0xff]  }
  0x3c   :  { %v4128_v14 = vld [vmem:[#allocation8 + $0x6c] ss:$16 sps:$4 sm:$0xff]   ;;  %v4130_v15 = vld [vmem:[#allocation8 + $0x60] ss:$16 sps:$4 sm:$0xff]   ;;  %v4131_v16 = vld [vmem:[#allocation8 + $0x68] ss:$16 sps:$4 sm:$0xff]  }
  0x3d   :  { %v4132_v17 = vld [vmem:[#allocation8 + $0x84] ss:$16 sps:$4 sm:$0xff]   ;;  %v4134_v18 = vld [vmem:[#allocation8 + $0x8c] ss:$16 sps:$4 sm:$0xff]   ;;  %v4136_v19 = vld [vmem:[#allocation8 + $0x80] ss:$16 sps:$4 sm:$0xff]  }
  0x3e   :  { %348 = vmatpush1.bf16.msra.mxu0 %v4118_v7  ;;  %461 = vmatpush1.bf16.msra.mxu1 %v4119_v8  ;;  %v4137_v20 = vld [vmem:[#allocation8 + $0x88] ss:$16 sps:$4 sm:$0xff]   ;;  %v4138_v21 = vld [vmem:[#allocation8 + $0xa4] ss:$16 sps:$4 sm:$0xff]   ;;  %v4140_v22 = vld [vmem:[#allocation8 + $0xac] ss:$16 sps:$4 sm:$0xff]  }
  0x3f   :  { %349 = vmatprep.subr.bf16.mxu0 %v4120_v9  ;;  %462 = vmatprep.subr.bf16.mxu1 %v4122_v10  ;;  %v4142_v23 = vld [vmem:[#allocation8 + $0xa0] ss:$16 sps:$4 sm:$0xff]   ;;  %v4143_v24 = vld [vmem:[#allocation8 + $0xa8] ss:$16 sps:$4 sm:$0xff]   ;;  %v4144_v25 = vld [vmem:[#allocation8 + $0xc4] ss:$16 sps:$4 sm:$0xff]   ;;  %v117_v10 = vlaneseq }
  0x40   :  { %v4146_v26 = vld [vmem:[#allocation8 + $0xcc] ss:$16 sps:$4 sm:$0xff]   ;;  %v4148_v27 = vld [vmem:[#allocation8 + $0xc0] ss:$16 sps:$4 sm:$0xff]   ;;  %v4149_v28 = vld [vmem:[#allocation8 + $0xc8] ss:$16 sps:$4 sm:$0xff]  }
  0x41   :  { %v4150_v29 = vld [vmem:[#allocation8 + $0xe4] ss:$16 sps:$4 sm:$0xff]   ;;  %v4152_v30 = vld [vmem:[#allocation8 + $0xec] ss:$16 sps:$4 sm:$0xff]   ;;  %v4154_v31 = vld [vmem:[#allocation8 + $0xe0] ss:$16 sps:$4 sm:$0xff]  }
  0x42   :  { %350 = vmatpush1.bf16.msra.mxu0 %v4124_v11  ;;  %463 = vmatpush1.bf16.msra.mxu1 %v4125_v12  ;;  %v4155_v32 = vld [vmem:[#allocation8 + $0xe8] ss:$16 sps:$4 sm:$0xff]   ;;  %v4697_v33 = vld [vmem:[#allocation10 + $0x4] ss:$16 sps:$4 sm:$0xff]   ;;  %v4699_v34 = vld [vmem:[#allocation10 + $0xc] ss:$16 sps:$4 sm:$0xff]  }
  0x43   :  { %351 = vmatprep.subr.bf16.mxu0 %v4126_v13  ;;  %464 = vmatprep.subr.bf16.mxu1 %v4128_v14  ;;  %v4156_v35 = vld [vmem:[#allocation5] sm:$0xff]   ;;  %v4707_v38 = vld [vmem:[#allocation10 + $0x8] ss:$16 sps:$4 sm:$0xff]   ;;  %v4709_v39 = vld [vmem:[#allocation10 + $0x2c] ss:$16 sps:$4 sm:$0xff]   ;;  %v118_v11 = vshrl.u32 %v117_v10, 7 }
  0x44   :  { %v4701_v36 = vld [vmem:[#allocation10] ss:$16 sps:$4 sm:$0xff]   ;;  %v4704_v37 = vld [vmem:[#allocation10 + $0x24] ss:$16 sps:$4 sm:$0xff]   ;;  %v4720_v42 = vld [vmem:[#allocation10 + $0x28] ss:$16 sps:$4 sm:$0xff]  }
  0x45   :  { %v4713_v40 = vld [vmem:[#allocation10 + $0x20] ss:$16 sps:$4 sm:$0xff]   ;;  %v4717_v41 = vld [vmem:[#allocation10 + $0x44] ss:$16 sps:$4 sm:$0xff]   ;;  %v4729_v46 = vld [vmem:[#allocation10 + $0x4c] ss:$16 sps:$4 sm:$0xff]  }
  0x46   :  { %352 = vmatpush1.bf16.msra.mxu0 %v4130_v15  ;;  %465 = vmatpush1.bf16.msra.mxu1 %v4131_v16  ;;  %v4724_v44 = vld [vmem:[#allocation10 + $0x40] ss:$16 sps:$4 sm:$0xff]   ;;  %v4727_v45 = vld [vmem:[#allocation10 + $0x64] ss:$16 sps:$4 sm:$0xff]   ;;  %v4732_v47 = vld [vmem:[#allocation10 + $0x48] ss:$16 sps:$4 sm:$0xff]  }
  0x47   :  { %353 = vmatprep.subr.bf16.mxu0 %v4132_v17  ;;  %466 = vmatprep.subr.bf16.mxu1 %v4134_v18  ;;  %v4734_v48 = vld [vmem:[#allocation10 + $0x6c] ss:$16 sps:$4 sm:$0xff]   ;;  %v4739_v49 = vld [vmem:[#allocation10 + $0x60] ss:$16 sps:$4 sm:$0xff]   ;;  %v4742_v50 = vld [vmem:[#allocation10 + $0x84] ss:$16 sps:$4 sm:$0xff]  }
  0x48   :  { %v4746_v51 = vld [vmem:[#allocation10 + $0x68] ss:$16 sps:$4 sm:$0xff]   ;;  %v4167_v52 = vld [vmem:[#allocation5 + $0x10] sm:$0xff]   ;;  %v4752_v54 = vld [vmem:[#allocation10 + $0x8c] ss:$16 sps:$4 sm:$0xff]   ;;  %v119_v12 = vsub.s32 0, %v118_v11 }
  0x49   :  { %v4749_v53 = vld [vmem:[#allocation10 + $0x80] ss:$16 sps:$4 sm:$0xff]   ;;  %v4755_v55 = vld [vmem:[#allocation10 + $0xa4] ss:$16 sps:$4 sm:$0xff]   ;;  %v4758_v56 = vld [vmem:[#allocation10 + $0x88] ss:$16 sps:$4 sm:$0xff]  }
  0x4a   :  { %354 = vmatpush1.bf16.msra.mxu0 %v4136_v19  ;;  %467 = vmatpush1.bf16.msra.mxu1 %v4137_v20  ;;  %v4760_v57 = vld [vmem:[#allocation10 + $0xac] ss:$16 sps:$4 sm:$0xff]   ;;  %v4762_v58 = vld [vmem:[#allocation10 + $0xa0] ss:$16 sps:$4 sm:$0xff]   ;;  %v4766_v59 = vld [vmem:[#allocation10 + $0xc4] ss:$16 sps:$4 sm:$0xff]  }
  0x4b   :  { %355 = vmatprep.subr.bf16.mxu0 %v4138_v21  ;;  %468 = vmatprep.subr.bf16.mxu1 %v4140_v22  ;;  %v4768_v60 = vld [vmem:[#allocation10 + $0xa8] ss:$16 sps:$4 sm:$0xff]   ;;  %v4774_v62 = vld [vmem:[#allocation10 + $0xc0] ss:$16 sps:$4 sm:$0xff]   ;;  %v4777_v63 = vld [vmem:[#allocation10 + $0xcc] ss:$16 sps:$4 sm:$0xff]  }
  0x4c   :  { %v4174_v61 = vld [vmem:[#allocation5 + $0x18] sm:$0xff]   ;;  %v4779_v1 = vld [vmem:[#allocation10 + $0xe4] ss:$16 sps:$4 sm:$0xff]   ;;  %v4788_v4 = vld [vmem:[#allocation10 + $0xe0] ss:$16 sps:$4 sm:$0xff]   ;;  %v123_v14 = vsub.s32 1, %v118_v11 }
  0x4d   :  { %v4781_v2 = vld [vmem:[#allocation10 + $0xc8] ss:$16 sps:$4 sm:$0xff]   ;;  %v4784_v3 = vld [vmem:[#allocation10 + $0xec] ss:$16 sps:$4 sm:$0xff]   ;;  %v4181_v6 = vld [vmem:[#allocation5 + $0x20] sm:$0xff]   ;;  %v127_v18 = vsub.s32 2, %v118_v11 }
  0x4e   :  { %356 = vmatpush1.bf16.msra.mxu0 %v4142_v23  ;;  %469 = vmatpush1.bf16.msra.mxu1 %v4143_v24  ;;  %v4792_v5 = vld [vmem:[#allocation10 + $0xe8] ss:$16 sps:$4 sm:$0xff]   ;;  %v4195_v8 = vld [vmem:[#allocation5 + $0x30] sm:$0xff]   ;;  %v115_v13 = vld [vmem:[%s5257_s2] sm:$0xf]  ;;  %s4624_s2 = smov [#allocation11]  }
  0x4f   :  { %357 = vmatprep.subr.bf16.mxu0 %v4144_v25  ;;  %470 = vmatprep.subr.bf16.mxu1 %v4146_v26  ;;  %v4188_v7 = vld [vmem:[#allocation5 + $0x28] sm:$0xff]   ;;  %v4202_v9 = vld [vmem:[#allocation5 + $0x38] sm:$0xff]   ;;  %v4850_v15 = vrot.slane %v115_v13, %v119_v12  ;;  %v4852_v16 = vrot.slane %v115_v13, %v123_v14  ;;  %s3535_s26 = sshll.u32 %s4624_s2, 4  ;;  %s3536_s26 = int_to_ptr.vmem [resolvable:$true] %s3535_s26 }
  0x50   :  { %s4588_s29 = scalar_lea.vmem %s3536_s26, 1024  ;;  %p4593_p11 = scmp.lt.s32.totalorder %s3536_s26, %s3536_s26 }
  0x51   :  { %p4589_p10 = scmp.ne.s32.totalorder %s3536_s26, %s4588_s29  ;;  %p4594_p12 = scmp.lt.s32.totalorder %s4588_s29, %s4588_s29 }
  0x52   :  { %358 = vmatpush1.bf16.msra.mxu0 %v4148_v27  ;;  %471 = vmatpush1.bf16.msra.mxu1 %v4149_v28  ;;  %v131_v27 = vsub.s32 3, %v118_v11 }
  0x53   :  { %359 = vmatprep.subr.bf16.mxu0 %v4150_v29  ;;  %472 = vmatprep.subr.bf16.mxu1 %v4152_v30  ;;  %p4595_p13 = por %p4594_p12, %p4593_p11 }
  0x55   :  { %p4596_p0 = pnand %p4595_p13, %p4589_p10 }
  0x56   :  { %360 = vmatpush1.bf16.msra.mxu0 %v4154_v31  ;;  %473 = vmatpush1.bf16.msra.mxu1 %v4155_v32  ;;  %v4857_v31 = vrot.slane %v115_v13, %v127_v18 }
  0x57   :  { %841 = vmatprep.subr.bf16.mxu0 %v4697_v33  ;;  %884 = vmatprep.subr.bf16.mxu1 %v4699_v34 }
  0x59   :  { %378 = vmatmul.mubr.bf16.vlgmr.msra.gmra.mrb[0].mxu0 %v4156_v35  ;;  %491 = vmatmul.mubr.bf16.vlgmr.msra.gmra.mrb[0].mxu1 %v4156_v35 }
  0x5a   :  { %842 = vmatpush1.bf16.msra.mxu0 %v4701_v36  ;;  %387 = vmatprep.mubr.bf16.mxu0 %v4623_v0 }
  0x5b   :  { %500 = vmatprep.mubr.bf16.mxu1 %v4623_v0  ;;  %843 = vmatprep.subr.bf16.mxu0 %v4704_v37 }
  0x5c   :  { %885 = vmatpush1.bf16.msra.mxu1 %v4707_v38 }
  0x5d   :  { %886 = vmatprep.subr.bf16.mxu1 %v4709_v39 }
  0x5e   :  { %844 = vmatpush1.bf16.msra.mxu0 %v4713_v40 }
  0x5f   :  { %845 = vmatprep.subr.bf16.mxu0 %v4717_v41 }
  0x60   :  { %887 = vmatpush1.bf16.msra.mxu1 %v4720_v42 }
  0x61   :  { %388 = vmatmul.mubr.bf16.gmra.mrb[4].mxu0 %v4160_v43  ;;  %501 = vmatmul.mubr.bf16.gmra.mrb[4].mxu1 %v4160_v43 }
  0x62   :  { %397 = vmatprep.mubr.bf16.mxu0 %v4623_v0  ;;  %510 = vmatprep.mubr.bf16.mxu1 %v4623_v0 }
  0x63   :  { %846 = vmatpush1.bf16.msra.mxu0 %v4724_v44  ;;  %888 = vmatprep.subr.bf16.mxu1 %v4729_v46 }
  0x64   :  { %847 = vmatprep.subr.bf16.mxu0 %v4727_v45  ;;  %889 = vmatpush1.bf16.msra.mxu1 %v4732_v47 }
  0x65   :  { %890 = vmatprep.subr.bf16.mxu1 %v4734_v48 }
  0x67   :  { %848 = vmatpush1.bf16.msra.mxu0 %v4739_v49 }
  0x68   :  { %849 = vmatprep.subr.bf16.mxu0 %v4742_v50  ;;  %891 = vmatpush1.bf16.msra.mxu1 %v4746_v51 }
  0x69   :  { %398 = vmatmul.mubr.bf16.gmra.mrb[8].mxu0 %v4167_v52  ;;  %511 = vmatmul.mubr.bf16.gmra.mrb[8].mxu1 %v4167_v52  ;;  %v4860_v52 = vrot.slane %v115_v13, %v131_v27 }
  0x6a   :  { %407 = vmatprep.mubr.bf16.mxu0 %v4623_v0  ;;  %520 = vmatprep.mubr.bf16.mxu1 %v4623_v0 }
  0x6b   :  { %850 = vmatpush1.bf16.msra.mxu0 %v4749_v53  ;;  %892 = vmatprep.subr.bf16.mxu1 %v4752_v54 }
  0x6c   :  { %851 = vmatprep.subr.bf16.mxu0 %v4755_v55  ;;  %893 = vmatpush1.bf16.msra.mxu1 %v4758_v56 }
  0x6d   :  { %894 = vmatprep.subr.bf16.mxu1 %v4760_v57 }
  0x6f   :  { %852 = vmatpush1.bf16.msra.mxu0 %v4762_v58 }
  0x70   :  { %853 = vmatprep.subr.bf16.mxu0 %v4766_v59  ;;  %895 = vmatpush1.bf16.msra.mxu1 %v4768_v60 }
  0x71   :  { %408 = vmatmul.mubr.bf16.gmra.mrb[12].mxu0 %v4174_v61  ;;  %521 = vmatmul.mubr.bf16.gmra.mrb[12].mxu1 %v4174_v61 }
  0x72   :  { %417 = vmatprep.mubr.bf16.mxu0 %v4623_v0  ;;  %530 = vmatprep.mubr.bf16.mxu1 %v4623_v0 }
  0x73   :  { %854 = vmatpush1.bf16.msra.mxu0 %v4774_v62  ;;  %896 = vmatprep.subr.bf16.mxu1 %v4777_v63 }
  0x74   :  { %855 = vmatprep.subr.bf16.mxu0 %v4779_v1  ;;  %897 = vmatpush1.bf16.msra.mxu1 %v4781_v2 }
  0x75   :  { %898 = vmatprep.subr.bf16.mxu1 %v4784_v3 }
  0x77   :  { %856 = vmatpush1.bf16.msra.mxu0 %v4788_v4 }
  0x78   :  { %899 = vmatpush1.bf16.msra.mxu1 %v4792_v5  ;;  %1202 = vmatprep.subr.bf16.mxu0 %v4697_v33 }
  0x79   :  { %418 = vmatmul.mubr.bf16.gmra.mrb[16].mxu0 %v4181_v6  ;;  %531 = vmatmul.mubr.bf16.gmra.mrb[16].mxu1 %v4181_v6 }
  0x7a   :  { %427 = vmatprep.mubr.bf16.mxu0 %v4623_v0  ;;  %540 = vmatprep.mubr.bf16.mxu1 %v4623_v0 }
  0x7b   :  { %1245 = vmatprep.subr.bf16.mxu1 %v4699_v34 }
  0x81   :  { %428 = vmatmul.mubr.bf16.gmra.mrb[20].mxu0 %v4188_v7  ;;  %541 = vmatmul.mubr.bf16.gmra.mrb[20].mxu1 %v4188_v7 }
  0x82   :  { %437 = vmatprep.mubr.bf16.mxu0 %v4623_v0  ;;  %550 = vmatprep.mubr.bf16.mxu1 %v4623_v0 }
  0x89   :  { %438 = vmatmul.mubr.bf16.gmra.mrb[24].mxu0 %v4195_v8  ;;  %551 = vmatmul.mubr.bf16.gmra.mrb[24].mxu1 %v4195_v8 }
  0x8a   :  { %447 = vmatprep.mubr.bf16.mxu0 %v4623_v0  ;;  %560 = vmatprep.mubr.bf16.mxu1 %v4623_v0 }
  0x91   :  { %448 = vmatmul.mubr.bf16.gmra.mrb[28].mxu0 %v4202_v9  ;;  %561 = vmatmul.mubr.bf16.gmra.mrb[28].mxu1 %v4202_v9 }
  0x92   :  { %873 = vmatprep.mubr.bf16.mxu0 %v4623_v0  ;;  %916 = vmatprep.mubr.bf16.mxu1 %v4623_v0 }
  0x99   :  { %874 = vmatmul.mubr.bf16.vlgmr.msra.gmra.mrb[0].mxu0 %v4623_v0  ;;  %917 = vmatmul.mubr.bf16.vlgmr.msra.gmra.mrb[0].mxu1 %v4623_v0 }
  0x9a   :  { %1203 = vmatpush1.bf16.msra.mxu0 %v4701_v36  ;;  %1246 = vmatpush1.bf16.msra.mxu1 %v4707_v38 }
  0x9b   :  { %1204 = vmatprep.subr.bf16.mxu0 %v4704_v37  ;;  %1247 = vmatprep.subr.bf16.mxu1 %v4709_v39 }
  0x9c   :  { %1234 = vmatprep.mubr.bf16.mxu0 %v4623_v0  ;;  %1277 = vmatprep.mubr.bf16.mxu1 %v4623_v0 }
  0x9e   :  { %1205 = vmatpush1.bf16.msra.mxu0 %v4713_v40  ;;  %1248 = vmatpush1.bf16.msra.mxu1 %v4720_v42 }
  0x9f   :  { %1206 = vmatprep.subr.bf16.mxu0 %v4717_v41  ;;  %1249 = vmatprep.subr.bf16.mxu1 %v4729_v46 }
  0xa2   :  { %1207 = vmatpush1.bf16.msra.mxu0 %v4724_v44  ;;  %1250 = vmatpush1.bf16.msra.mxu1 %v4732_v47 }
  0xa3   :  { %1208 = vmatprep.subr.bf16.mxu0 %v4727_v45  ;;  %1251 = vmatprep.subr.bf16.mxu1 %v4734_v48 }
  0xa6   :  { %1209 = vmatpush1.bf16.msra.mxu0 %v4739_v49  ;;  %1252 = vmatpush1.bf16.msra.mxu1 %v4746_v51 }
  0xa7   :  { %1210 = vmatprep.subr.bf16.mxu0 %v4742_v50  ;;  %1253 = vmatprep.subr.bf16.mxu1 %v4752_v54 }
  0xaa   :  { %1211 = vmatpush1.bf16.msra.mxu0 %v4749_v53  ;;  %1254 = vmatpush1.bf16.msra.mxu1 %v4758_v56 }
  0xab   :  { %1212 = vmatprep.subr.bf16.mxu0 %v4755_v55  ;;  %1255 = vmatprep.subr.bf16.mxu1 %v4760_v57 }
  0xae   :  { %1213 = vmatpush1.bf16.msra.mxu0 %v4762_v58  ;;  %1256 = vmatpush1.bf16.msra.mxu1 %v4768_v60 }
  0xaf   :  { %1214 = vmatprep.subr.bf16.mxu0 %v4766_v59  ;;  %1257 = vmatprep.subr.bf16.mxu1 %v4777_v63 }
  0xb2   :  { %1215 = vmatpush1.bf16.msra.mxu0 %v4774_v62  ;;  %1258 = vmatpush1.bf16.msra.mxu1 %v4781_v2 }
  0xb3   :  { %1216 = vmatprep.subr.bf16.mxu0 %v4779_v1  ;;  %1259 = vmatprep.subr.bf16.mxu1 %v4784_v3 }
  0xb6   :  { %1217 = vmatpush1.bf16.msra.mxu0 %v4788_v4  ;;  %1260 = vmatpush1.bf16.msra.mxu1 %v4792_v5 }
  0xb7   :  { %1564 = vmatprep.subr.bf16.mxu0 %v4697_v33  ;;  %1607 = vmatprep.subr.bf16.mxu1 %v4699_v34 }
 0x16c   :  { %v875_v17 = vpop.f32.mrb[0].mxu0  ;;  %v918_v19 = vpop.f32.mrb[0].mxu1 }
 0x16d   :  { %v3971_v20 = vadd.f32 %v875_v17, %v4850_v15  ;;  %v877_v21 = vpop.f32.mrb[1].mxu0  ;;  %v920_v22 = vpop.f32.mrb[1].mxu1  ;;  %v4003_v61 = vadd.f32 %v918_v19, %v4857_v31 }
 0x16e   :  { %v3972_v23 = vadd.f32 %v877_v21, %v4852_v16  ;;  %v879_v24 = vpop.f32.mrb[2].mxu0  ;;  %v922_v25 = vpop.f32.mrb[2].mxu1  ;;  %v4004_v7 = vadd.f32 %v920_v22, %v4860_v52 }
 0x16f   :  { %v3627_v26 = vmul.f32 -1.442695, %v3971_v20  ;;  %v3973_v28 = vadd.f32 %v879_v24, %v4850_v15  ;;  %v881_v29 = vpop.f32.mrb[3].mxu0  ;;  %v924_v30 = vpop.f32.mrb[3].mxu1  ;;  %v4005_v6 = vadd.f32 %v922_v25, %v4857_v31  ;;  %v3629_v8 = vmul.f32 -1.442695, %v4003_v61 }
 0x170   :  { %v3628_v32 = vmul.f32 -1.442695, %v3972_v23  ;;  %v3974_v33 = vadd.f32 %v881_v29, %v4852_v16  ;;  %v4006_v11 = vadd.f32 %v924_v30, %v4860_v52 }
 0x171   :  { %4266 = vpow2.f32 %v3627_v26  ;;  %v3630_v35 = vmul.f32 -1.442695, %v3973_v28  ;;  %v3632_v9 = vmul.f32 -1.442695, %v4005_v6 }
 0x172   :  { %v3631_v43 = vmul.f32 -1.442695, %v3974_v33  ;;  %4268 = vpow2.f32 %v3628_v32 }
 0x173   :  { %4270 = vpow2.f32 %v3630_v35 }
 0x174   :  { %4272 = vpow2.f32 %v3631_v43 }
 0x175   :  { %4274 = vtanh.f32 %v4004_v7 }
 0x176   :  { %4276 = vpow2.f32 %v3629_v8 }
 0x177   :  { %4278 = vpow2.f32 %v3632_v9 }
 0x17b   :  { %v4267_v10 = vpop.eup %4266 }
 0x17c   :  { %v953_v12 = vadd.f32 1.0, %v4267_v10  ;;  %v4269_v14 = vpop.eup %4268 }
 0x17d   :  { %v4271_v13 = vpop.eup %4270  ;;  %v954_v17 = vadd.f32 1.0, %v4269_v14 }
 0x17e   :  { %4280 = vrcp.f32 %v953_v12  ;;  %v956_v18 = vadd.f32 1.0, %v4271_v13  ;;  %v4273_v19 = vpop.eup %4272 }
 0x17f   :  { %4282 = vtanh.f32 %v4006_v11  ;;  %v957_v20 = vadd.f32 1.0, %v4273_v19  ;;  %v4275_v21 = vpop.eup %4274 }
 0x180   :  { %4284 = vrcp.f32 %v954_v17  ;;  %v4277_v22 = vpop.eup %4276 }
 0x181   :  { %4286 = vrcp.f32 %v956_v18  ;;  %v4279_v23 = vpop.eup %4278  ;;  %v955_v29 = vadd.f32 1.0, %v4277_v22 }
 0x182   :  { %4288 = vrcp.f32 %v957_v20  ;;  %v958_v43 = vadd.f32 1.0, %v4279_v23 }
 0x183   :  { %4290 = vrcp.f32 %v955_v29 }
 0x188   :  { %v4281_v24 = vpop.eup %4280 }
 0x189   :  { %v4283_v25 = vpop.eup %4282  ;;  %v975_v26 = vmul.f32 %v4281_v24, %v4275_v21 }
 0x18a   :  { %v4285_v27 = vpop.eup %4284 }
 0x18b   :  { %v4287_v28 = vpop.eup %4286  ;;  %v973_v30 = vmul.f32 0.0, %v4285_v27 }
 0x18c   :  { %v976_v32 = vmul.f32 %v4287_v28, %v4283_v25  ;;  %v4289_v33 = vpop.eup %4288 }
 0x18d   :  { %v4866_v35 = vadd.f32 %v975_v26, %v973_v30  ;;  %v974_v61 = vmul.f32 0.0, %v4289_v33  ;;  %v4291_v7 = vpop.eup %4290 }
 0x18f   :  { %4292 = vtanh.f32 %v4866_v35  ;;  %v4869_v6 = vadd.f32 %v976_v32, %v974_v61 }
 0x190   :  { %4294 = vrcp.f32 %v958_v43 }
 0x191   :  { %4296 = vtanh.f32 %v4869_v6 }
 0x199   :  { %v4293_v8 = vpop.eup %4292 }
 0x19a   :  { %v4295_v9 = vpop.eup %4294  ;;  %v981_v11 = vmul.f32 %v4293_v8, %v4291_v7 }
 0x19b   :  { %v4297_v10 = vpop.eup %4296 }
 0x19c   :  { %v982_v12 = vmul.f32 %v4297_v10, %v4295_v9 }
 0x19e   :  { %v983_v14 = vpack.c.bf16 %v982_v12, %v981_v11 }
 0x1a0   :  { %3935 = vst [vmem:[#allocation11] sm:$0xff] %v983_v14   ;;  %1235 = vmatmul.mubr.bf16.vlgmr.msra.gmra.mrb[4].mxu0 %v983_v14  ;;  %1278 = vmatmul.mubr.bf16.vlgmr.msra.gmra.mrb[4].mxu1 %v983_v14 }
 0x1a1   :  { %1565 = vmatpush1.bf16.msra.mxu0 %v4701_v36  ;;  %1608 = vmatpush1.bf16.msra.mxu1 %v4707_v38 }
 0x1a2   :  { %1566 = vmatprep.subr.bf16.mxu0 %v4704_v37  ;;  %1609 = vmatprep.subr.bf16.mxu1 %v4709_v39 }
 0x1a3   :  { %1596 = vmatprep.mubr.bf16.mxu0 %v4623_v0  ;;  %1639 = vmatprep.mubr.bf16.mxu1 %v4623_v0 }
 0x1a5   :  { %1567 = vmatpush1.bf16.msra.mxu0 %v4713_v40  ;;  %1610 = vmatpush1.bf16.msra.mxu1 %v4720_v42 }
 0x1a6   :  { %1568 = vmatprep.subr.bf16.mxu0 %v4717_v41  ;;  %1611 = vmatprep.subr.bf16.mxu1 %v4729_v46 }
 0x1a9   :  { %1569 = vmatpush1.bf16.msra.mxu0 %v4724_v44  ;;  %1612 = vmatpush1.bf16.msra.mxu1 %v4732_v47 }
 0x1aa   :  { %1570 = vmatprep.subr.bf16.mxu0 %v4727_v45  ;;  %1613 = vmatprep.subr.bf16.mxu1 %v4734_v48 }
 0x1ad   :  { %1571 = vmatpush1.bf16.msra.mxu0 %v4739_v49  ;;  %1614 = vmatpush1.bf16.msra.mxu1 %v4746_v51 }
 0x1ae   :  { %1572 = vmatprep.subr.bf16.mxu0 %v4742_v50  ;;  %1615 = vmatprep.subr.bf16.mxu1 %v4752_v54 }
 0x1b1   :  { %1573 = vmatpush1.bf16.msra.mxu0 %v4749_v53  ;;  %1616 = vmatpush1.bf16.msra.mxu1 %v4758_v56 }
 0x1b2   :  { %1574 = vmatprep.subr.bf16.mxu0 %v4755_v55  ;;  %1617 = vmatprep.subr.bf16.mxu1 %v4760_v57 }
 0x1b5   :  { %1575 = vmatpush1.bf16.msra.mxu0 %v4762_v58  ;;  %1618 = vmatpush1.bf16.msra.mxu1 %v4768_v60 }
 0x1b6   :  { %1576 = vmatprep.subr.bf16.mxu0 %v4766_v59  ;;  %1619 = vmatprep.subr.bf16.mxu1 %v4777_v63 }
 0x1b9   :  { %1577 = vmatpush1.bf16.msra.mxu0 %v4774_v62  ;;  %1620 = vmatpush1.bf16.msra.mxu1 %v4781_v2 }
 0x1ba   :  { %1578 = vmatprep.subr.bf16.mxu0 %v4779_v1  ;;  %1621 = vmatprep.subr.bf16.mxu1 %v4784_v3 }
 0x1bd   :  { %1579 = vmatpush1.bf16.msra.mxu0 %v4788_v4  ;;  %1622 = vmatpush1.bf16.msra.mxu1 %v4792_v5 }
 0x1be   :  { %1969 = vmatprep.subr.bf16.mxu1 %v4699_v34 }
 0x273   :  { %v1236_v36 = vpop.f32.mrb[4].mxu0  ;;  %v1279_v37 = vpop.f32.mrb[4].mxu1 }
 0x274   :  { %v3975_v40 = vadd.f32 %v1236_v36, %v4850_v15  ;;  %v1238_v13 = vpop.f32.mrb[5].mxu0  ;;  %v1281_v17 = vpop.f32.mrb[5].mxu1  ;;  %v4007_v28 = vadd.f32 %v1279_v37, %v4857_v31 }
 0x275   :  { %v3976_v18 = vadd.f32 %v1238_v13, %v4852_v16  ;;  %v1240_v19 = vpop.f32.mrb[6].mxu0  ;;  %v1283_v20 = vpop.f32.mrb[6].mxu1  ;;  %v4008_v30 = vadd.f32 %v1281_v17, %v4860_v52 }
 0x276   :  { %v3667_v21 = vmul.f32 -1.442695, %v3975_v40  ;;  %v3977_v22 = vadd.f32 %v1240_v19, %v4850_v15  ;;  %v1242_v23 = vpop.f32.mrb[7].mxu0  ;;  %v1285_v24 = vpop.f32.mrb[7].mxu1  ;;  %v4009_v29 = vadd.f32 %v1283_v20, %v4857_v31  ;;  %v3669_v32 = vmul.f32 -1.442695, %v4007_v28 }
 0x277   :  { %v3668_v25 = vmul.f32 -1.442695, %v3976_v18  ;;  %v3978_v26 = vadd.f32 %v1242_v23, %v4852_v16  ;;  %v4010_v61 = vadd.f32 %v1285_v24, %v4860_v52 }
 0x278   :  { %4298 = vpow2.f32 %v3667_v21  ;;  %v3670_v34 = vmul.f32 -1.442695, %v3977_v22  ;;  %v3672_v33 = vmul.f32 -1.442695, %v4009_v29 }
 0x279   :  { %v3671_v27 = vmul.f32 -1.442695, %v3978_v26  ;;  %4300 = vpow2.f32 %v3668_v25 }
 0x27a   :  { %4302 = vpow2.f32 %v3670_v34 }
 0x27b   :  { %4304 = vpow2.f32 %v3671_v27 }
 0x27c   :  { %4306 = vtanh.f32 %v4008_v30 }
 0x27d   :  { %4308 = vpow2.f32 %v3669_v32 }
 0x27e   :  { %4310 = vpow2.f32 %v3672_v33 }
 0x282   :  { %v4299_v43 = vpop.eup %4298 }
 0x283   :  { %v1314_v7 = vadd.f32 1.0, %v4299_v43  ;;  %v4301_v8 = vpop.eup %4300 }
 0x284   :  { %v4303_v9 = vpop.eup %4302  ;;  %v1315_v10 = vadd.f32 1.0, %v4301_v8 }
 0x285   :  { %4312 = vrcp.f32 %v1314_v7  ;;  %v1317_v11 = vadd.f32 1.0, %v4303_v9  ;;  %v4305_v12 = vpop.eup %4304 }
 0x286   :  { %4314 = vtanh.f32 %v4010_v61  ;;  %v1318_v14 = vadd.f32 1.0, %v4305_v12  ;;  %v4307_v36 = vpop.eup %4306 }
 0x287   :  { %4316 = vrcp.f32 %v1315_v10  ;;  %v4309_v37 = vpop.eup %4308 }
 0x288   :  { %4318 = vrcp.f32 %v1317_v11  ;;  %v4311_v40 = vpop.eup %4310  ;;  %v1316_v21 = vadd.f32 1.0, %v4309_v37 }
 0x289   :  { %4320 = vrcp.f32 %v1318_v14  ;;  %v1319_v26 = vadd.f32 1.0, %v4311_v40 }
 0x28a   :  { %4322 = vrcp.f32 %v1316_v21 }
 0x28f   :  { %v4313_v13 = vpop.eup %4312 }
 0x290   :  { %v4315_v17 = vpop.eup %4314  ;;  %v1336_v18 = vmul.f32 %v4313_v13, %v4307_v36 }
 0x291   :  { %v4317_v19 = vpop.eup %4316 }
 0x292   :  { %v4319_v20 = vpop.eup %4318  ;;  %v1334_v22 = vmul.f32 %v4317_v19, %v4866_v35 }
 0x293   :  { %v1337_v23 = vmul.f32 %v4319_v20, %v4315_v17  ;;  %v4321_v24 = vpop.eup %4320 }
 0x294   :  { %v4914_v25 = vadd.f32 %v1336_v18, %v1334_v22  ;;  %v1335_v34 = vmul.f32 %v4321_v24, %v4869_v6  ;;  %v4323_v28 = vpop.eup %4322 }
 0x296   :  { %4324 = vtanh.f32 %v4914_v25  ;;  %v4918_v27 = vadd.f32 %v1337_v23, %v1335_v34 }
 0x297   :  { %4326 = vrcp.f32 %v1319_v26 }
 0x298   :  { %4328 = vtanh.f32 %v4918_v27 }
 0x2a0   :  { %v4325_v29 = vpop.eup %4324 }
 0x2a1   :  { %v4327_v30 = vpop.eup %4326  ;;  %v1342_v35 = vmul.f32 %v4325_v29, %v4323_v28 }
 0x2a2   :  { %v4329_v32 = vpop.eup %4328 }
 0x2a3   :  { %v1343_v33 = vmul.f32 %v4329_v32, %v4327_v30 }
 0x2a5   :  { %v1344_v43 = vpack.c.bf16 %v1343_v33, %v1342_v35 }
 0x2a7   :  { %3940 = vst [vmem:[#allocation11 + $0x8] sm:$0xff] %v1344_v43   ;;  %1597 = vmatmul.mubr.bf16.vlgmr.msra.gmra.mrb[8].mxu0 %v1344_v43  ;;  %1640 = vmatmul.mubr.bf16.vlgmr.msra.gmra.mrb[8].mxu1 %v1344_v43  ;;  %v4986_v43 = vld [vmem:[#allocation10 + $0x8] ss:$16 sps:$4 sm:$0xff]  }
 0x2a8   :  { %1970 = vmatpush1.bf16.msra.mxu1 %v4707_v38  ;;  %1958 = vmatprep.mubr.bf16.mxu0 %v4623_v0  ;;  %v4938_v38 = vld [vmem:[#allocation10 + $0x4] ss:$16 sps:$4 sm:$0xff]  }
 0x2a9   :  { %1971 = vmatprep.subr.bf16.mxu1 %v4709_v39  ;;  %2001 = vmatprep.mubr.bf16.mxu1 %v4623_v0  ;;  %v4940_v39 = vld [vmem:[#allocation10] ss:$16 sps:$4 sm:$0xff]  }
 0x2aa   :  { %1926 = vmatprep.subr.bf16.mxu0 %v4938_v38 }
 0x2ab   :  { %1927 = vmatpush1.bf16.msra.mxu0 %v4940_v39 }
 0x2ac   :  { %1972 = vmatpush1.bf16.msra.mxu1 %v4720_v42  ;;  %v4944_v42 = vld [vmem:[#allocation10 + $0x24] ss:$16 sps:$4 sm:$0xff]  }
 0x2ad   :  { %1973 = vmatprep.subr.bf16.mxu1 %v4729_v46  ;;  %v4946_v46 = vld [vmem:[#allocation10 + $0x20] ss:$16 sps:$4 sm:$0xff]   ;;  %1928 = vmatprep.subr.bf16.mxu0 %v4944_v42 }
 0x2af   :  { %1929 = vmatpush1.bf16.msra.mxu0 %v4946_v46 }
 0x2b0   :  { %1974 = vmatpush1.bf16.msra.mxu1 %v4732_v47  ;;  %1930 = vmatprep.subr.bf16.mxu0 %v4717_v41 }
 0x2b1   :  { %1975 = vmatprep.subr.bf16.mxu1 %v4734_v48 }
 0x2b3   :  { %1931 = vmatpush1.bf16.msra.mxu0 %v4724_v44 }
 0x2b4   :  { %1976 = vmatpush1.bf16.msra.mxu1 %v4746_v51  ;;  %1932 = vmatprep.subr.bf16.mxu0 %v4727_v45 }
 0x2b5   :  { %1977 = vmatprep.subr.bf16.mxu1 %v4752_v54 }
 0x2b7   :  { %1933 = vmatpush1.bf16.msra.mxu0 %v4739_v49 }
 0x2b8   :  { %1978 = vmatpush1.bf16.msra.mxu1 %v4758_v56  ;;  %1934 = vmatprep.subr.bf16.mxu0 %v4742_v50 }
 0x2b9   :  { %1979 = vmatprep.subr.bf16.mxu1 %v4760_v57 }
 0x2bb   :  { %1935 = vmatpush1.bf16.msra.mxu0 %v4749_v53 }
 0x2bc   :  { %1980 = vmatpush1.bf16.msra.mxu1 %v4768_v60  ;;  %1936 = vmatprep.subr.bf16.mxu0 %v4755_v55 }
 0x2bd   :  { %1981 = vmatprep.subr.bf16.mxu1 %v4777_v63 }
 0x2bf   :  { %1937 = vmatpush1.bf16.msra.mxu0 %v4762_v58 }
 0x2c0   :  { %1982 = vmatpush1.bf16.msra.mxu1 %v4781_v2  ;;  %1938 = vmatprep.subr.bf16.mxu0 %v4766_v59 }
 0x2c1   :  { %1983 = vmatprep.subr.bf16.mxu1 %v4784_v3 }
 0x2c3   :  { %1939 = vmatpush1.bf16.msra.mxu0 %v4774_v62 }
 0x2c4   :  { %1984 = vmatpush1.bf16.msra.mxu1 %v4792_v5  ;;  %1940 = vmatprep.subr.bf16.mxu0 %v4779_v1 }
 0x2c7   :  { %1941 = vmatpush1.bf16.msra.mxu0 %v4788_v4 }
 0x2c8   :  { %2288 = vmatprep.subr.bf16.mxu0 %v4938_v38 }
 0x37a   :  { %v1598_v41 = vpop.f32.mrb[8].mxu0  ;;  %v1641_v44 = vpop.f32.mrb[8].mxu1 }
 0x37b   :  { %v3979_v45 = vadd.f32 %v1598_v41, %v4850_v15  ;;  %v1600_v47 = vpop.f32.mrb[9].mxu0  ;;  %v1643_v48 = vpop.f32.mrb[9].mxu1  ;;  %v4011_v62 = vadd.f32 %v1641_v44, %v4857_v31  ;;  %v4990_v41 = vld [vmem:[#allocation10 + $0x2c] ss:$16 sps:$4 sm:$0xff]   ;;  %v4992_v44 = vld [vmem:[#allocation10 + $0x28] ss:$16 sps:$4 sm:$0xff]  }
 0x37c   :  { %v3980_v49 = vadd.f32 %v1600_v47, %v4852_v16  ;;  %v1602_v50 = vpop.f32.mrb[10].mxu0  ;;  %v1645_v51 = vpop.f32.mrb[10].mxu1  ;;  %v4012_v1 = vadd.f32 %v1643_v48, %v4860_v52  ;;  %v4998_v47 = vld [vmem:[#allocation10 + $0x4c] ss:$16 sps:$4 sm:$0xff]   ;;  %v5000_v48 = vld [vmem:[#allocation10 + $0x40] ss:$16 sps:$4 sm:$0xff]  }
 0x37d   :  { %v3707_v53 = vmul.f32 -1.442695, %v3979_v45  ;;  %v3981_v54 = vadd.f32 %v1602_v50, %v4850_v15  ;;  %v1604_v55 = vpop.f32.mrb[11].mxu0  ;;  %v1647_v56 = vpop.f32.mrb[11].mxu1  ;;  %v4013_v63 = vadd.f32 %v1645_v51, %v4857_v31  ;;  %v3709_v2 = vmul.f32 -1.442695, %v4011_v62 }
 0x37e   :  { %v3708_v57 = vmul.f32 -1.442695, %v3980_v49  ;;  %v3982_v58 = vadd.f32 %v1604_v55, %v4852_v16  ;;  %v4014_v5 = vadd.f32 %v1647_v56, %v4860_v52  ;;  %v4996_v45 = vld [vmem:[#allocation10 + $0x44] ss:$16 sps:$4 sm:$0xff]   ;;  %v5002_v49 = vld [vmem:[#allocation10 + $0x48] ss:$16 sps:$4 sm:$0xff]  }
 0x37f   :  { %4330 = vpow2.f32 %v3707_v53  ;;  %v3710_v59 = vmul.f32 -1.442695, %v3981_v54  ;;  %v3712_v3 = vmul.f32 -1.442695, %v4013_v63  ;;  %v5008_v50 = vld [vmem:[#allocation10 + $0x64] ss:$16 sps:$4 sm:$0xff]  }
 0x380   :  { %v3711_v60 = vmul.f32 -1.442695, %v3982_v58  ;;  %4332 = vpow2.f32 %v3708_v57  ;;  %v5010_v51 = vld [vmem:[#allocation10 + $0x6c] ss:$16 sps:$4 sm:$0xff]   ;;  %v5012_v53 = vld [vmem:[#allocation10 + $0x60] ss:$16 sps:$4 sm:$0xff]  }
 0x381   :  { %4334 = vpow2.f32 %v3710_v59  ;;  %v5014_v54 = vld [vmem:[#allocation10 + $0x68] ss:$16 sps:$4 sm:$0xff]   ;;  %v5020_v55 = vld [vmem:[#allocation10 + $0x80] ss:$16 sps:$4 sm:$0xff]   ;;  %v5022_v56 = vld [vmem:[#allocation10 + $0x84] ss:$16 sps:$4 sm:$0xff]  }
 0x382   :  { %4336 = vpow2.f32 %v3711_v60  ;;  %v5024_v57 = vld [vmem:[#allocation10 + $0x88] ss:$16 sps:$4 sm:$0xff]   ;;  %v5026_v58 = vld [vmem:[#allocation10 + $0x8c] ss:$16 sps:$4 sm:$0xff]   ;;  %v5028_v59 = vld [vmem:[#allocation10 + $0xa4] ss:$16 sps:$4 sm:$0xff]  }
 0x383   :  { %4338 = vtanh.f32 %v4012_v1  ;;  %v5031_v60 = vld [vmem:[#allocation10 + $0xac] ss:$16 sps:$4 sm:$0xff]   ;;  %v5035_v62 = vld [vmem:[#allocation10 + $0xa0] ss:$16 sps:$4 sm:$0xff]   ;;  %v5039_v63 = vld [vmem:[#allocation10 + $0xa8] ss:$16 sps:$4 sm:$0xff]  }
 0x384   :  { %4340 = vpow2.f32 %v3709_v2  ;;  %v5041_v1 = vld [vmem:[#allocation10 + $0xc4] ss:$16 sps:$4 sm:$0xff]   ;;  %v5044_v2 = vld [vmem:[#allocation10 + $0xcc] ss:$16 sps:$4 sm:$0xff]  }
 0x385   :  { %4342 = vpow2.f32 %v3712_v3  ;;  %v5047_v3 = vld [vmem:[#allocation10 + $0xc0] ss:$16 sps:$4 sm:$0xff]  }
 0x389   :  { %v4331_v4 = vpop.eup %4330 }
 0x38a   :  { %v1676_v6 = vadd.f32 1.0, %v4331_v4  ;;  %v4333_v61 = vpop.eup %4332  ;;  %v5051_v4 = vld [vmem:[#allocation10 + $0xc8] ss:$16 sps:$4 sm:$0xff]  }
 0x38b   :  { %v4335_v7 = vpop.eup %4334  ;;  %v1677_v8 = vadd.f32 1.0, %v4333_v61  ;;  %v5059_v61 = vld [vmem:[#allocation10 + $0xe0] ss:$16 sps:$4 sm:$0xff]  }
 0x38c   :  { %4344 = vrcp.f32 %v1676_v6  ;;  %v1679_v9 = vadd.f32 1.0, %v4335_v7  ;;  %v4337_v10 = vpop.eup %4336  ;;  %v5056_v6 = vld [vmem:[#allocation10 + $0xec] ss:$16 sps:$4 sm:$0xff]   ;;  %v5063_v7 = vld [vmem:[#allocation10 + $0xe8] ss:$16 sps:$4 sm:$0xff]  }
 0x38d   :  { %4346 = vtanh.f32 %v4014_v5  ;;  %v1680_v11 = vadd.f32 1.0, %v4337_v10  ;;  %v4339_v12 = vpop.eup %4338  ;;  %v5053_v5 = vld [vmem:[#allocation10 + $0xe4] ss:$16 sps:$4 sm:$0xff]  }
 0x38e   :  { %4348 = vrcp.f32 %v1677_v8  ;;  %v4341_v14 = vpop.eup %4340 }
 0x38f   :  { %4350 = vrcp.f32 %v1679_v9  ;;  %v4343_v36 = vpop.eup %4342  ;;  %v1678_v19 = vadd.f32 1.0, %v4341_v14 }
 0x390   :  { %4352 = vrcp.f32 %v1680_v11  ;;  %v1681_v24 = vadd.f32 1.0, %v4343_v36 }
 0x391   :  { %4354 = vrcp.f32 %v1678_v19 }
 0x396   :  { %v4345_v37 = vpop.eup %4344 }
 0x397   :  { %v4347_v40 = vpop.eup %4346  ;;  %v1698_v13 = vmul.f32 %v4345_v37, %v4339_v12 }
 0x398   :  { %v4349_v17 = vpop.eup %4348 }
 0x399   :  { %v4351_v18 = vpop.eup %4350  ;;  %v1696_v20 = vmul.f32 %v4349_v17, %v4914_v25 }
 0x39a   :  { %v1699_v21 = vmul.f32 %v4351_v18, %v4347_v40  ;;  %v4353_v22 = vpop.eup %4352 }
 0x39b   :  { %v4972_v23 = vadd.f32 %v1698_v13, %v1696_v20  ;;  %v1697_v26 = vmul.f32 %v4353_v22, %v4918_v27  ;;  %v4355_v28 = vpop.eup %4354  ;;  %v4984_v27 = vld [vmem:[#allocation10 + $0xc] ss:$16 sps:$4 sm:$0xff]  }
 0x39c   :  { %2331 = vmatprep.subr.bf16.mxu1 %v4984_v27 }
 0x39d   :  { %4356 = vtanh.f32 %v4972_v23  ;;  %v4976_v34 = vadd.f32 %v1699_v21, %v1697_v26 }
 0x39e   :  { %4358 = vrcp.f32 %v1681_v24 }
 0x39f   :  { %4360 = vtanh.f32 %v4976_v34 }
 0x3a7   :  { %v4357_v29 = vpop.eup %4356 }
 0x3a8   :  { %v4359_v30 = vpop.eup %4358  ;;  %v1704_v25 = vmul.f32 %v4357_v29, %v4355_v28 }
 0x3a9   :  { %v4361_v32 = vpop.eup %4360 }
 0x3aa   :  { %v1705_v35 = vmul.f32 %v4361_v32, %v4359_v30 }
 0x3ac   :  { %v1706_v33 = vpack.c.bf16 %v1705_v35, %v1704_v25 }
 0x3ae   :  { %3945 = vst [vmem:[#allocation11 + $0x10] sm:$0xff] %v1706_v33   ;;  %1959 = vmatmul.mubr.bf16.vlgmr.msra.gmra.mrb[12].mxu0 %v1706_v33  ;;  %2002 = vmatmul.mubr.bf16.vlgmr.msra.gmra.mrb[12].mxu1 %v1706_v33 }
 0x3af   :  { %2289 = vmatpush1.bf16.msra.mxu0 %v4940_v39  ;;  %2320 = vmatprep.mubr.bf16.mxu0 %v4623_v0 }
 0x3b0   :  { %2290 = vmatprep.subr.bf16.mxu0 %v4944_v42  ;;  %2363 = vmatprep.mubr.bf16.mxu1 %v4623_v0 }
 0x3b1   :  { %2332 = vmatpush1.bf16.msra.mxu1 %v4986_v43 }
 0x3b2   :  { %2333 = vmatprep.subr.bf16.mxu1 %v4990_v41 }
 0x3b3   :  { %2291 = vmatpush1.bf16.msra.mxu0 %v4946_v46 }
 0x3b4   :  { %2292 = vmatprep.subr.bf16.mxu0 %v4996_v45 }
 0x3b5   :  { %2334 = vmatpush1.bf16.msra.mxu1 %v4992_v44 }
 0x3b6   :  { %2335 = vmatprep.subr.bf16.mxu1 %v4998_v47 }
 0x3b7   :  { %2293 = vmatpush1.bf16.msra.mxu0 %v5000_v48 }
 0x3b8   :  { %2294 = vmatprep.subr.bf16.mxu0 %v5008_v50 }
 0x3b9   :  { %2336 = vmatpush1.bf16.msra.mxu1 %v5002_v49 }
 0x3ba   :  { %2337 = vmatprep.subr.bf16.mxu1 %v5010_v51 }
 0x3bb   :  { %2295 = vmatpush1.bf16.msra.mxu0 %v5012_v53 }
 0x3bc   :  { %2296 = vmatprep.subr.bf16.mxu0 %v5022_v56 }
 0x3bd   :  { %2338 = vmatpush1.bf16.msra.mxu1 %v5014_v54 }
 0x3be   :  { %2339 = vmatprep.subr.bf16.mxu1 %v5026_v58 }
 0x3bf   :  { %2297 = vmatpush1.bf16.msra.mxu0 %v5020_v55 }
 0x3c0   :  { %2298 = vmatprep.subr.bf16.mxu0 %v5028_v59 }
 0x3c1   :  { %2340 = vmatpush1.bf16.msra.mxu1 %v5024_v57 }
 0x3c2   :  { %2341 = vmatprep.subr.bf16.mxu1 %v5031_v60 }
 0x3c3   :  { %2299 = vmatpush1.bf16.msra.mxu0 %v5035_v62 }
 0x3c4   :  { %2300 = vmatprep.subr.bf16.mxu0 %v5041_v1 }
 0x3c5   :  { %2342 = vmatpush1.bf16.msra.mxu1 %v5039_v63 }
 0x3c6   :  { %2343 = vmatprep.subr.bf16.mxu1 %v5044_v2 }
 0x3c7   :  { %2301 = vmatpush1.bf16.msra.mxu0 %v5047_v3 }
 0x3c8   :  { %2302 = vmatprep.subr.bf16.mxu0 %v5053_v5 }
 0x3c9   :  { %2344 = vmatpush1.bf16.msra.mxu1 %v5051_v4 }
 0x3ca   :  { %2345 = vmatprep.subr.bf16.mxu1 %v5056_v6 }
 0x3cb   :  { %2303 = vmatpush1.bf16.msra.mxu0 %v5059_v61 }
 0x3cc   :  { %2650 = vmatprep.subr.bf16.mxu0 %v4938_v38 }
 0x3cd   :  { %2346 = vmatpush1.bf16.msra.mxu1 %v5063_v7 }
 0x3ce   :  { %2693 = vmatprep.subr.bf16.mxu1 %v4984_v27 }
 0x481   :  { %v1960_v8 = vpop.f32.mrb[12].mxu0  ;;  %v2003_v9 = vpop.f32.mrb[12].mxu1 }
 0x482   :  { %v3983_v10 = vadd.f32 %v1960_v8, %v4850_v15  ;;  %v1962_v11 = vpop.f32.mrb[13].mxu0  ;;  %v2005_v12 = vpop.f32.mrb[13].mxu1  ;;  %v4015_v24 = vadd.f32 %v2003_v9, %v4857_v31 }
 0x483   :  { %v3984_v14 = vadd.f32 %v1962_v11, %v4852_v16  ;;  %v1964_v36 = vpop.f32.mrb[14].mxu0  ;;  %v2007_v37 = vpop.f32.mrb[14].mxu1  ;;  %v4016_v28 = vadd.f32 %v2005_v12, %v4860_v52 }
 0x484   :  { %v3747_v40 = vmul.f32 -1.442695, %v3983_v10  ;;  %v3985_v13 = vadd.f32 %v1964_v36, %v4850_v15  ;;  %v1966_v17 = vpop.f32.mrb[15].mxu0  ;;  %v2009_v18 = vpop.f32.mrb[15].mxu1  ;;  %v4017_v26 = vadd.f32 %v2007_v37, %v4857_v31  ;;  %v3749_v29 = vmul.f32 -1.442695, %v4015_v24 }
 0x485   :  { %v3748_v19 = vmul.f32 -1.442695, %v3984_v14  ;;  %v3986_v20 = vadd.f32 %v1966_v17, %v4852_v16  ;;  %v4018_v25 = vadd.f32 %v2009_v18, %v4860_v52 }
 0x486   :  { %4362 = vpow2.f32 %v3747_v40  ;;  %v3750_v21 = vmul.f32 -1.442695, %v3985_v13  ;;  %v3752_v30 = vmul.f32 -1.442695, %v4017_v26 }
 0x487   :  { %v3751_v22 = vmul.f32 -1.442695, %v3986_v20  ;;  %4364 = vpow2.f32 %v3748_v19 }
 0x488   :  { %4366 = vpow2.f32 %v3750_v21 }
 0x489   :  { %4368 = vpow2.f32 %v3751_v22 }
 0x48a   :  { %4370 = vtanh.f32 %v4016_v28 }
 0x48b   :  { %4372 = vpow2.f32 %v3749_v29 }
 0x48c   :  { %4374 = vpow2.f32 %v3752_v30 }
 0x490   :  { %v4363_v32 = vpop.eup %4362 }
 0x491   :  { %v2038_v35 = vadd.f32 1.0, %v4363_v32  ;;  %v4365_v33 = vpop.eup %4364 }
 0x492   :  { %v4367_v8 = vpop.eup %4366  ;;  %v2039_v10 = vadd.f32 1.0, %v4365_v33 }
 0x493   :  { %4376 = vrcp.f32 %v2038_v35  ;;  %v2041_v9 = vadd.f32 1.0, %v4367_v8  ;;  %v4369_v11 = vpop.eup %4368 }
 0x494   :  { %4378 = vtanh.f32 %v4018_v25  ;;  %v2042_v14 = vadd.f32 1.0, %v4369_v11  ;;  %v4371_v12 = vpop.eup %4370 }
 0x495   :  { %4380 = vrcp.f32 %v2039_v10  ;;  %v4373_v36 = vpop.eup %4372 }
 0x496   :  { %4382 = vrcp.f32 %v2041_v9  ;;  %v4375_v37 = vpop.eup %4374  ;;  %v2040_v20 = vadd.f32 1.0, %v4373_v36 }
 0x497   :  { %4384 = vrcp.f32 %v2042_v14  ;;  %v2043_v28 = vadd.f32 1.0, %v4375_v37 }
 0x498   :  { %4386 = vrcp.f32 %v2040_v20 }
 0x49d   :  { %v4377_v40 = vpop.eup %4376 }
 0x49e   :  { %v4379_v13 = vpop.eup %4378  ;;  %v2060_v17 = vmul.f32 %v4377_v40, %v4371_v12 }
 0x49f   :  { %v4381_v18 = vpop.eup %4380 }
 0x4a0   :  { %v4383_v19 = vpop.eup %4382  ;;  %v2058_v21 = vmul.f32 %v4381_v18, %v4972_v23 }
 0x4a1   :  { %v2061_v22 = vmul.f32 %v4383_v19, %v4379_v13  ;;  %v4385_v24 = vpop.eup %4384 }
 0x4a2   :  { %v5079_v26 = vadd.f32 %v2060_v17, %v2058_v21  ;;  %v2059_v29 = vmul.f32 %v4385_v24, %v4976_v34  ;;  %v4387_v32 = vpop.eup %4386 }
 0x4a4   :  { %4388 = vtanh.f32 %v5079_v26  ;;  %v5083_v30 = vadd.f32 %v2061_v22, %v2059_v29 }
 0x4a5   :  { %4390 = vrcp.f32 %v2043_v28 }
 0x4a6   :  { %4392 = vtanh.f32 %v5083_v30 }
 0x4ae   :  { %v4389_v25 = vpop.eup %4388 }
 0x4af   :  { %v4391_v35 = vpop.eup %4390  ;;  %v2066_v23 = vmul.f32 %v4389_v25, %v4387_v32 }
 0x4b0   :  { %v4393_v33 = vpop.eup %4392 }
 0x4b1   :  { %v2067_v8 = vmul.f32 %v4393_v33, %v4391_v35 }
 0x4b3   :  { %v2068_v10 = vpack.c.bf16 %v2067_v8, %v2066_v23 }
 0x4b5   :  { %3950 = vst [vmem:[#allocation11 + $0x18] sm:$0xff] %v2068_v10   ;;  %2321 = vmatmul.mubr.bf16.vlgmr.msra.gmra.mrb[16].mxu0 %v2068_v10  ;;  %2364 = vmatmul.mubr.bf16.vlgmr.msra.gmra.mrb[16].mxu1 %v2068_v10 }
 0x4b6   :  { %2651 = vmatpush1.bf16.msra.mxu0 %v4940_v39  ;;  %2694 = vmatpush1.bf16.msra.mxu1 %v4986_v43 }
 0x4b7   :  { %2652 = vmatprep.subr.bf16.mxu0 %v4944_v42  ;;  %2695 = vmatprep.subr.bf16.mxu1 %v4990_v41 }
 0x4b8   :  { %2682 = vmatprep.mubr.bf16.mxu0 %v4623_v0  ;;  %2725 = vmatprep.mubr.bf16.mxu1 %v4623_v0 }
 0x4ba   :  { %2653 = vmatpush1.bf16.msra.mxu0 %v4946_v46  ;;  %2696 = vmatpush1.bf16.msra.mxu1 %v4992_v44 }
 0x4bb   :  { %2654 = vmatprep.subr.bf16.mxu0 %v4996_v45  ;;  %2697 = vmatprep.subr.bf16.mxu1 %v4998_v47 }
 0x4be   :  { %2655 = vmatpush1.bf16.msra.mxu0 %v5000_v48  ;;  %2698 = vmatpush1.bf16.msra.mxu1 %v5002_v49 }
 0x4bf   :  { %2656 = vmatprep.subr.bf16.mxu0 %v5008_v50  ;;  %2699 = vmatprep.subr.bf16.mxu1 %v5010_v51 }
 0x4c2   :  { %2657 = vmatpush1.bf16.msra.mxu0 %v5012_v53  ;;  %2700 = vmatpush1.bf16.msra.mxu1 %v5014_v54 }
 0x4c3   :  { %2658 = vmatprep.subr.bf16.mxu0 %v5022_v56  ;;  %2701 = vmatprep.subr.bf16.mxu1 %v5026_v58 }
 0x4c6   :  { %2659 = vmatpush1.bf16.msra.mxu0 %v5020_v55  ;;  %2702 = vmatpush1.bf16.msra.mxu1 %v5024_v57 }
 0x4c7   :  { %2660 = vmatprep.subr.bf16.mxu0 %v5028_v59  ;;  %2703 = vmatprep.subr.bf16.mxu1 %v5031_v60 }
 0x4ca   :  { %2661 = vmatpush1.bf16.msra.mxu0 %v5035_v62  ;;  %2704 = vmatpush1.bf16.msra.mxu1 %v5039_v63 }
 0x4cb   :  { %2662 = vmatprep.subr.bf16.mxu0 %v5041_v1  ;;  %2705 = vmatprep.subr.bf16.mxu1 %v5044_v2 }
 0x4ce   :  { %2663 = vmatpush1.bf16.msra.mxu0 %v5047_v3  ;;  %2706 = vmatpush1.bf16.msra.mxu1 %v5051_v4 }
 0x4cf   :  { %2664 = vmatprep.subr.bf16.mxu0 %v5053_v5  ;;  %2707 = vmatprep.subr.bf16.mxu1 %v5056_v6 }
 0x4d2   :  { %2665 = vmatpush1.bf16.msra.mxu0 %v5059_v61  ;;  %2708 = vmatpush1.bf16.msra.mxu1 %v5063_v7 }
 0x4d3   :  { %3012 = vmatprep.subr.bf16.mxu0 %v4938_v38  ;;  %3055 = vmatprep.subr.bf16.mxu1 %v4984_v27 }
 0x588   :  { %v2322_v34 = vpop.f32.mrb[16].mxu0  ;;  %v2365_v9 = vpop.f32.mrb[16].mxu1 }
 0x589   :  { %v3987_v11 = vadd.f32 %v2322_v34, %v4850_v15  ;;  %v2324_v14 = vpop.f32.mrb[17].mxu0  ;;  %v2367_v12 = vpop.f32.mrb[17].mxu1  ;;  %v4019_v24 = vadd.f32 %v2365_v9, %v4857_v31 }
 0x58a   :  { %v3988_v36 = vadd.f32 %v2324_v14, %v4852_v16  ;;  %v2326_v37 = vpop.f32.mrb[18].mxu0  ;;  %v2369_v40 = vpop.f32.mrb[18].mxu1  ;;  %v4020_v29 = vadd.f32 %v2367_v12, %v4860_v52 }
 0x58b   :  { %v3787_v13 = vmul.f32 -1.442695, %v3987_v11  ;;  %v3989_v17 = vadd.f32 %v2326_v37, %v4850_v15  ;;  %v2328_v18 = vpop.f32.mrb[19].mxu0  ;;  %v2371_v19 = vpop.f32.mrb[19].mxu1  ;;  %v4021_v28 = vadd.f32 %v2369_v40, %v4857_v31  ;;  %v3789_v32 = vmul.f32 -1.442695, %v4019_v24 }
 0x58c   :  { %v3788_v20 = vmul.f32 -1.442695, %v3988_v36  ;;  %v3990_v38 = vadd.f32 %v2328_v18, %v4852_v16  ;;  %v4022_v33 = vadd.f32 %v2371_v19, %v4860_v52 }
 0x58d   :  { %4394 = vpow2.f32 %v3787_v13  ;;  %v3790_v21 = vmul.f32 -1.442695, %v3989_v17  ;;  %v3792_v25 = vmul.f32 -1.442695, %v4021_v28 }
 0x58e   :  { %v3791_v22 = vmul.f32 -1.442695, %v3990_v38  ;;  %4396 = vpow2.f32 %v3788_v20 }
 0x58f   :  { %4398 = vpow2.f32 %v3790_v21 }
 0x590   :  { %4400 = vpow2.f32 %v3791_v22 }
 0x591   :  { %4402 = vtanh.f32 %v4020_v29 }
 0x592   :  { %4404 = vpow2.f32 %v3789_v32 }
 0x593   :  { %4406 = vpow2.f32 %v3792_v25 }
 0x597   :  { %v4395_v35 = vpop.eup %4394 }
 0x598   :  { %v2400_v23 = vadd.f32 1.0, %v4395_v35  ;;  %v4397_v8 = vpop.eup %4396 }
 0x599   :  { %v4399_v10 = vpop.eup %4398  ;;  %v2401_v34 = vadd.f32 1.0, %v4397_v8 }
 0x59a   :  { %4408 = vrcp.f32 %v2400_v23  ;;  %v2403_v9 = vadd.f32 1.0, %v4399_v10  ;;  %v4401_v11 = vpop.eup %4400 }
 0x59b   :  { %4410 = vtanh.f32 %v4022_v33  ;;  %v2404_v14 = vadd.f32 1.0, %v4401_v11  ;;  %v4403_v12 = vpop.eup %4402 }
 0x59c   :  { %4412 = vrcp.f32 %v2401_v34  ;;  %v4405_v36 = vpop.eup %4404 }
 0x59d   :  { %4414 = vrcp.f32 %v2403_v9  ;;  %v4407_v37 = vpop.eup %4406  ;;  %v2402_v20 = vadd.f32 1.0, %v4405_v36 }
 0x59e   :  { %4416 = vrcp.f32 %v2404_v14  ;;  %v2405_v28 = vadd.f32 1.0, %v4407_v37 }
 0x59f   :  { %4418 = vrcp.f32 %v2402_v20 }
 0x5a4   :  { %v4409_v40 = vpop.eup %4408 }
 0x5a5   :  { %v4411_v13 = vpop.eup %4410  ;;  %v2422_v17 = vmul.f32 %v4409_v40, %v4403_v12 }
 0x5a6   :  { %v4413_v18 = vpop.eup %4412 }
 0x5a7   :  { %v4415_v19 = vpop.eup %4414  ;;  %v2420_v38 = vmul.f32 %v4413_v18, %v5079_v26 }
 0x5a8   :  { %v2423_v21 = vmul.f32 %v4415_v19, %v4411_v13  ;;  %v4417_v22 = vpop.eup %4416 }
 0x5a9   :  { %v5129_v24 = vadd.f32 %v2422_v17, %v2420_v38  ;;  %v2421_v29 = vmul.f32 %v4417_v22, %v5083_v30  ;;  %v4419_v25 = vpop.eup %4418 }
 0x5ab   :  { %4420 = vtanh.f32 %v5129_v24  ;;  %v5133_v32 = vadd.f32 %v2423_v21, %v2421_v29 }
 0x5ac   :  { %4422 = vrcp.f32 %v2405_v28 }
 0x5ad   :  { %4424 = vtanh.f32 %v5133_v32 }
 0x5b5   :  { %v4421_v35 = vpop.eup %4420 }
 0x5b6   :  { %v4423_v33 = vpop.eup %4422  ;;  %v2428_v26 = vmul.f32 %v4421_v35, %v4419_v25 }
 0x5b7   :  { %v4425_v23 = vpop.eup %4424 }
 0x5b8   :  { %v2429_v8 = vmul.f32 %v4425_v23, %v4423_v33 }
 0x5ba   :  { %v2430_v10 = vpack.c.bf16 %v2429_v8, %v2428_v26 }
 0x5bc   :  { %3955 = vst [vmem:[#allocation11 + $0x20] sm:$0xff] %v2430_v10   ;;  %2683 = vmatmul.mubr.bf16.vlgmr.msra.gmra.mrb[20].mxu0 %v2430_v10  ;;  %2726 = vmatmul.mubr.bf16.vlgmr.msra.gmra.mrb[20].mxu1 %v2430_v10 }
 0x5bd   :  { %3013 = vmatpush1.bf16.msra.mxu0 %v4940_v39  ;;  %3056 = vmatpush1.bf16.msra.mxu1 %v4986_v43 }
 0x5be   :  { %3014 = vmatprep.subr.bf16.mxu0 %v4944_v42  ;;  %3057 = vmatprep.subr.bf16.mxu1 %v4990_v41 }
 0x5bf   :  { %3044 = vmatprep.mubr.bf16.mxu0 %v4623_v0  ;;  %3087 = vmatprep.mubr.bf16.mxu1 %v4623_v0 }
 0x5c1   :  { %3015 = vmatpush1.bf16.msra.mxu0 %v4946_v46  ;;  %3058 = vmatpush1.bf16.msra.mxu1 %v4992_v44 }
 0x5c2   :  { %3016 = vmatprep.subr.bf16.mxu0 %v4996_v45  ;;  %3059 = vmatprep.subr.bf16.mxu1 %v4998_v47 }
 0x5c5   :  { %3017 = vmatpush1.bf16.msra.mxu0 %v5000_v48  ;;  %3060 = vmatpush1.bf16.msra.mxu1 %v5002_v49 }
 0x5c6   :  { %3018 = vmatprep.subr.bf16.mxu0 %v5008_v50  ;;  %3061 = vmatprep.subr.bf16.mxu1 %v5010_v51 }
 0x5c9   :  { %3019 = vmatpush1.bf16.msra.mxu0 %v5012_v53  ;;  %3062 = vmatpush1.bf16.msra.mxu1 %v5014_v54 }
 0x5ca   :  { %3020 = vmatprep.subr.bf16.mxu0 %v5022_v56  ;;  %3063 = vmatprep.subr.bf16.mxu1 %v5026_v58 }
 0x5cd   :  { %3021 = vmatpush1.bf16.msra.mxu0 %v5020_v55  ;;  %3064 = vmatpush1.bf16.msra.mxu1 %v5024_v57 }
 0x5ce   :  { %3022 = vmatprep.subr.bf16.mxu0 %v5028_v59  ;;  %3065 = vmatprep.subr.bf16.mxu1 %v5031_v60 }
 0x5d1   :  { %3023 = vmatpush1.bf16.msra.mxu0 %v5035_v62  ;;  %3066 = vmatpush1.bf16.msra.mxu1 %v5039_v63 }
 0x5d2   :  { %3024 = vmatprep.subr.bf16.mxu0 %v5041_v1  ;;  %3067 = vmatprep.subr.bf16.mxu1 %v5044_v2 }
 0x5d5   :  { %3025 = vmatpush1.bf16.msra.mxu0 %v5047_v3  ;;  %3068 = vmatpush1.bf16.msra.mxu1 %v5051_v4 }
 0x5d6   :  { %3026 = vmatprep.subr.bf16.mxu0 %v5053_v5  ;;  %3069 = vmatprep.subr.bf16.mxu1 %v5056_v6 }
 0x5d9   :  { %3027 = vmatpush1.bf16.msra.mxu0 %v5059_v61  ;;  %3070 = vmatpush1.bf16.msra.mxu1 %v5063_v7 }
 0x5da   :  { %3417 = vmatprep.subr.bf16.mxu1 %v4984_v27 }
 0x68f   :  { %v2684_v39 = vpop.f32.mrb[20].mxu0  ;;  %v2727_v42 = vpop.f32.mrb[20].mxu1 }
 0x690   :  { %v3991_v46 = vadd.f32 %v2684_v39, %v4850_v15  ;;  %v2686_v30 = vpop.f32.mrb[21].mxu0  ;;  %v2729_v34 = vpop.f32.mrb[21].mxu1  ;;  %v4023_v19 = vadd.f32 %v2727_v42, %v4857_v31 }
 0x691   :  { %v3992_v9 = vadd.f32 %v2686_v30, %v4852_v16  ;;  %v2688_v11 = vpop.f32.mrb[22].mxu0  ;;  %v2731_v14 = vpop.f32.mrb[22].mxu1  ;;  %v4024_v38 = vadd.f32 %v2729_v34, %v4860_v52 }
 0x692   :  { %v3827_v12 = vmul.f32 -1.442695, %v3991_v46  ;;  %v3993_v36 = vadd.f32 %v2688_v11, %v4850_v15  ;;  %v2690_v37 = vpop.f32.mrb[23].mxu0  ;;  %v2733_v40 = vpop.f32.mrb[23].mxu1  ;;  %v4025_v20 = vadd.f32 %v2731_v14, %v4857_v31  ;;  %v3829_v21 = vmul.f32 -1.442695, %v4023_v19 }
 0x693   :  { %v3828_v13 = vmul.f32 -1.442695, %v3992_v9  ;;  %v3994_v17 = vadd.f32 %v2690_v37, %v4852_v16  ;;  %v4026_v29 = vadd.f32 %v2733_v40, %v4860_v52 }
 0x694   :  { %4426 = vpow2.f32 %v3827_v12  ;;  %v3830_v27 = vmul.f32 -1.442695, %v3993_v36  ;;  %v3832_v22 = vmul.f32 -1.442695, %v4025_v20 }
 0x695   :  { %v3831_v18 = vmul.f32 -1.442695, %v3994_v17  ;;  %4428 = vpow2.f32 %v3828_v13 }
 0x696   :  { %4430 = vpow2.f32 %v3830_v27 }
 0x697   :  { %4432 = vpow2.f32 %v3831_v18 }
 0x698   :  { %4434 = vtanh.f32 %v4024_v38 }
 0x699   :  { %4436 = vpow2.f32 %v3829_v21 }
 0x69a   :  { %4438 = vpow2.f32 %v3832_v22 }
 0x69e   :  { %v4427_v28 = vpop.eup %4426 }
 0x69f   :  { %v2762_v25 = vadd.f32 1.0, %v4427_v28  ;;  %v4429_v35 = vpop.eup %4428 }
 0x6a0   :  { %v4431_v33 = vpop.eup %4430  ;;  %v2763_v23 = vadd.f32 1.0, %v4429_v35 }
 0x6a1   :  { %4440 = vrcp.f32 %v2762_v25  ;;  %v2765_v26 = vadd.f32 1.0, %v4431_v33  ;;  %v4433_v8 = vpop.eup %4432 }
 0x6a2   :  { %4442 = vtanh.f32 %v4026_v29  ;;  %v2766_v10 = vadd.f32 1.0, %v4433_v8  ;;  %v4435_v39 = vpop.eup %4434 }
 0x6a3   :  { %4444 = vrcp.f32 %v2763_v23  ;;  %v4437_v42 = vpop.eup %4436 }
 0x6a4   :  { %4446 = vrcp.f32 %v2765_v26  ;;  %v4439_v46 = vpop.eup %4438  ;;  %v2764_v12 = vadd.f32 1.0, %v4437_v42 }
 0x6a5   :  { %4448 = vrcp.f32 %v2766_v10  ;;  %v2767_v17 = vadd.f32 1.0, %v4439_v46 }
 0x6a6   :  { %4450 = vrcp.f32 %v2764_v12 }
 0x6ab   :  { %v4441_v30 = vpop.eup %4440 }
 0x6ac   :  { %v4443_v34 = vpop.eup %4442  ;;  %v2784_v9 = vmul.f32 %v4441_v30, %v4435_v39 }
 0x6ad   :  { %v4445_v11 = vpop.eup %4444 }
 0x6ae   :  { %v4447_v14 = vpop.eup %4446  ;;  %v2782_v36 = vmul.f32 %v4445_v11, %v5129_v24 }
 0x6af   :  { %v2785_v37 = vmul.f32 %v4447_v14, %v4443_v34  ;;  %v4449_v40 = vpop.eup %4448 }
 0x6b0   :  { %v5178_v13 = vadd.f32 %v2784_v9, %v2782_v36  ;;  %v2783_v27 = vmul.f32 %v4449_v40, %v5133_v32  ;;  %v4451_v19 = vpop.eup %4450 }
 0x6b2   :  { %4452 = vtanh.f32 %v5178_v13  ;;  %v5182_v18 = vadd.f32 %v2785_v37, %v2783_v27 }
 0x6b3   :  { %4454 = vrcp.f32 %v2767_v17 }
 0x6b4   :  { %4456 = vtanh.f32 %v5182_v18 }
 0x6bc   :  { %v4453_v20 = vpop.eup %4452 }
 0x6bd   :  { %v4455_v38 = vpop.eup %4454  ;;  %v2790_v24 = vmul.f32 %v4453_v20, %v4451_v19 }
 0x6be   :  { %v4457_v21 = vpop.eup %4456 }
 0x6bf   :  { %v2791_v22 = vmul.f32 %v4457_v21, %v4455_v38 }
 0x6c1   :  { %v2792_v28 = vpack.c.bf16 %v2791_v22, %v2790_v24 }
 0x6c3   :  { %3960 = vst [vmem:[#allocation11 + $0x28] sm:$0xff] %v2792_v28   ;;  %3045 = vmatmul.mubr.bf16.vlgmr.msra.gmra.mrb[24].mxu0 %v2792_v28  ;;  %3088 = vmatmul.mubr.bf16.vlgmr.msra.gmra.mrb[24].mxu1 %v2792_v28 }
 0x6c4   :  { %3418 = vmatpush1.bf16.msra.mxu1 %v4986_v43  ;;  %3406 = vmatprep.mubr.bf16.mxu0 %v4623_v0  ;;  %v4260_v43 = vld [vmem:[#allocation10] ss:$16 sps:$4 sm:$0xff]  }
 0x6c5   :  { %3419 = vmatprep.subr.bf16.mxu1 %v4990_v41  ;;  %3449 = vmatprep.mubr.bf16.mxu1 %v4623_v0  ;;  %v4262_v0 = vld [vmem:[#allocation10 + $0x4] ss:$16 sps:$4 sm:$0xff]  }
 0x6c6   :  { %3374 = vmatprep.subr.bf16.mxu0 %v4262_v0  ;;  %v4265_v41 = vld [vmem:[#allocation10 + $0x24] ss:$16 sps:$4 sm:$0xff]  }
 0x6c7   :  { %3375 = vmatpush1.bf16.msra.mxu0 %v4260_v43 }
 0x6c8   :  { %3420 = vmatpush1.bf16.msra.mxu1 %v4992_v44  ;;  %v4263_v44 = vld [vmem:[#allocation10 + $0x20] ss:$16 sps:$4 sm:$0xff]   ;;  %3376 = vmatprep.subr.bf16.mxu0 %v4265_v41 }
 0x6c9   :  { %3421 = vmatprep.subr.bf16.mxu1 %v4998_v47 }
 0x6cb   :  { %3377 = vmatpush1.bf16.msra.mxu0 %v4263_v44 }
 0x6cc   :  { %3422 = vmatpush1.bf16.msra.mxu1 %v5002_v49  ;;  %3378 = vmatprep.subr.bf16.mxu0 %v4996_v45 }
 0x6cd   :  { %3423 = vmatprep.subr.bf16.mxu1 %v5010_v51 }
 0x6cf   :  { %3379 = vmatpush1.bf16.msra.mxu0 %v5000_v48 }
 0x6d0   :  { %3424 = vmatpush1.bf16.msra.mxu1 %v5014_v54  ;;  %3380 = vmatprep.subr.bf16.mxu0 %v5008_v50 }
 0x6d1   :  { %3425 = vmatprep.subr.bf16.mxu1 %v5026_v58 }
 0x6d3   :  { %3381 = vmatpush1.bf16.msra.mxu0 %v5012_v53 }
 0x6d4   :  { %3426 = vmatpush1.bf16.msra.mxu1 %v5024_v57  ;;  %3382 = vmatprep.subr.bf16.mxu0 %v5022_v56 }
 0x6d5   :  { %3427 = vmatprep.subr.bf16.mxu1 %v5031_v60 }
 0x6d7   :  { %3383 = vmatpush1.bf16.msra.mxu0 %v5020_v55 }
 0x6d8   :  { %3428 = vmatpush1.bf16.msra.mxu1 %v5039_v63  ;;  %3384 = vmatprep.subr.bf16.mxu0 %v5028_v59 }
 0x6d9   :  { %3429 = vmatprep.subr.bf16.mxu1 %v5044_v2 }
 0x6db   :  { %3385 = vmatpush1.bf16.msra.mxu0 %v5035_v62 }
 0x6dc   :  { %3430 = vmatpush1.bf16.msra.mxu1 %v5051_v4  ;;  %3386 = vmatprep.subr.bf16.mxu0 %v5041_v1 }
 0x6dd   :  { %3431 = vmatprep.subr.bf16.mxu1 %v5056_v6 }
 0x6df   :  { %3387 = vmatpush1.bf16.msra.mxu0 %v5047_v3 }
 0x6e0   :  { %3432 = vmatpush1.bf16.msra.mxu1 %v5063_v7  ;;  %3388 = vmatprep.subr.bf16.mxu0 %v5053_v5 }
 0x6e3   :  { %3389 = vmatpush1.bf16.msra.mxu0 %v5059_v61 }
 0x796   :  { %v3046_v45 = vpop.f32.mrb[24].mxu0  ;;  %v3089_v47 = vpop.f32.mrb[24].mxu1 }
 0x797   :  { %v3995_v48 = vadd.f32 %v3046_v45, %v4850_v15  ;;  %v3048_v49 = vpop.f32.mrb[25].mxu0  ;;  %v3091_v50 = vpop.f32.mrb[25].mxu1  ;;  %v4027_v1 = vadd.f32 %v3089_v47, %v4857_v31 }
 0x798   :  { %v3996_v51 = vadd.f32 %v3048_v49, %v4852_v16  ;;  %v3050_v53 = vpop.f32.mrb[26].mxu0  ;;  %v3093_v54 = vpop.f32.mrb[26].mxu1  ;;  %v4028_v3 = vadd.f32 %v3091_v50, %v4860_v52 }
 0x799   :  { %v3867_v55 = vmul.f32 -1.442695, %v3995_v48  ;;  %v3997_v56 = vadd.f32 %v3050_v53, %v4850_v15  ;;  %v3052_v57 = vpop.f32.mrb[27].mxu0  ;;  %v3095_v58 = vpop.f32.mrb[27].mxu1  ;;  %v4029_v2 = vadd.f32 %v3093_v54, %v4857_v31  ;;  %v3869_v4 = vmul.f32 -1.442695, %v4027_v1 }
 0x79a   :  { %v3868_v59 = vmul.f32 -1.442695, %v3996_v51  ;;  %v3998_v60 = vadd.f32 %v3052_v57, %v4852_v16  ;;  %v4030_v61 = vadd.f32 %v3095_v58, %v4860_v52 }
 0x79b   :  { %4458 = vpow2.f32 %v3867_v55  ;;  %v3870_v62 = vmul.f32 -1.442695, %v3997_v56  ;;  %v3872_v5 = vmul.f32 -1.442695, %v4029_v2 }
 0x79c   :  { %v3871_v63 = vmul.f32 -1.442695, %v3998_v60  ;;  %4460 = vpow2.f32 %v3868_v59 }
 0x79d   :  { %4462 = vpow2.f32 %v3870_v62 }
 0x79e   :  { %4464 = vpow2.f32 %v3871_v63 }
 0x79f   :  { %4466 = vtanh.f32 %v4028_v3 }
 0x7a0   :  { %4468 = vpow2.f32 %v3869_v4 }
 0x7a1   :  { %4470 = vpow2.f32 %v3872_v5 }
 0x7a5   :  { %v4459_v6 = vpop.eup %4458 }
 0x7a6   :  { %v3124_v7 = vadd.f32 1.0, %v4459_v6  ;;  %v4461_v32 = vpop.eup %4460 }
 0x7a7   :  { %v4463_v29 = vpop.eup %4462  ;;  %v3125_v25 = vadd.f32 1.0, %v4461_v32 }
 0x7a8   :  { %4472 = vrcp.f32 %v3124_v7  ;;  %v3127_v35 = vadd.f32 1.0, %v4463_v29  ;;  %v4465_v33 = vpop.eup %4464 }
 0x7a9   :  { %4474 = vtanh.f32 %v4030_v61  ;;  %v3128_v23 = vadd.f32 1.0, %v4465_v33  ;;  %v4467_v26 = vpop.eup %4466 }
 0x7aa   :  { %4476 = vrcp.f32 %v3125_v25  ;;  %v4469_v8 = vpop.eup %4468 }
 0x7ab   :  { %4478 = vrcp.f32 %v3127_v35  ;;  %v4471_v10 = vpop.eup %4470  ;;  %v3126_v9 = vadd.f32 1.0, %v4469_v8 }
 0x7ac   :  { %4480 = vrcp.f32 %v3128_v23  ;;  %v3129_v37 = vadd.f32 1.0, %v4471_v10 }
 0x7ad   :  { %4482 = vrcp.f32 %v3126_v9 }
 0x7b2   :  { %v4473_v39 = vpop.eup %4472 }
 0x7b3   :  { %v4475_v42 = vpop.eup %4474  ;;  %v3146_v46 = vmul.f32 %v4473_v39, %v4467_v26 }
 0x7b4   :  { %v4477_v30 = vpop.eup %4476 }
 0x7b5   :  { %v4479_v34 = vpop.eup %4478  ;;  %v3144_v11 = vmul.f32 %v4477_v30, %v5178_v13 }
 0x7b6   :  { %v3147_v14 = vmul.f32 %v4479_v34, %v4475_v42  ;;  %v4481_v12 = vpop.eup %4480 }
 0x7b7   :  { %v5223_v36 = vadd.f32 %v3146_v46, %v3144_v11  ;;  %v3145_v40 = vmul.f32 %v4481_v12, %v5182_v18  ;;  %v4483_v27 = vpop.eup %4482 }
 0x7b9   :  { %4484 = vtanh.f32 %v5223_v36  ;;  %v5227_v17 = vadd.f32 %v3147_v14, %v3145_v40 }
 0x7ba   :  { %4486 = vrcp.f32 %v3129_v37 }
 0x7bb   :  { %4488 = vtanh.f32 %v5227_v17 }
 0x7c3   :  { %v4485_v19 = vpop.eup %4484 }
 0x7c4   :  { %v4487_v20 = vpop.eup %4486  ;;  %v3152_v13 = vmul.f32 %v4485_v19, %v4483_v27 }
 0x7c5   :  { %v4489_v38 = vpop.eup %4488 }
 0x7c6   :  { %v3153_v21 = vmul.f32 %v4489_v38, %v4487_v20 }
 0x7c8   :  { %v3154_v24 = vpack.c.bf16 %v3153_v21, %v3152_v13 }
 0x7ca   :  { %3965 = vst [vmem:[#allocation11 + $0x30] sm:$0xff] %v3154_v24   ;;  %3407 = vmatmul.mubr.bf16.vlgmr.msra.gmra.mrb[28].mxu0 %v3154_v24  ;;  %3450 = vmatmul.mubr.bf16.vlgmr.msra.gmra.mrb[28].mxu1 %v3154_v24 }
 0x89d   :  { %v3408_v22 = vpop.f32.mrb[28].mxu0  ;;  %v3451_v18 = vpop.f32.mrb[28].mxu1 }
 0x89e   :  { %v3999_v28 = vadd.f32 %v3408_v22, %v4850_v15  ;;  %v3410_v0 = vpop.f32.mrb[29].mxu0  ;;  %v3453_v43 = vpop.f32.mrb[29].mxu1  ;;  %v4031_v56 = vadd.f32 %v3451_v18, %v4857_v31 }
 0x89f   :  { %v4000_v41 = vadd.f32 %v3410_v0, %v4852_v16  ;;  %v3412_v44 = vpop.f32.mrb[30].mxu0  ;;  %v3455_v45 = vpop.f32.mrb[30].mxu1  ;;  %v4032_v58 = vadd.f32 %v3453_v43, %v4860_v52 }
 0x8a0   :  { %v3907_v47 = vmul.f32 -1.442695, %v3999_v28  ;;  %v4001_v48 = vadd.f32 %v3412_v44, %v4850_v15  ;;  %v3414_v49 = vpop.f32.mrb[31].mxu0  ;;  %v3457_v50 = vpop.f32.mrb[31].mxu1  ;;  %v4033_v57 = vadd.f32 %v3455_v45, %v4857_v31  ;;  %v3909_v59 = vmul.f32 -1.442695, %v4031_v56 }
 0x8a1   :  { %v3908_v51 = vmul.f32 -1.442695, %v4000_v41  ;;  %v4002_v53 = vadd.f32 %v3414_v49, %v4852_v16  ;;  %v4034_v62 = vadd.f32 %v3457_v50, %v4860_v52 }
 0x8a2   :  { %4490 = vpow2.f32 %v3907_v47  ;;  %v3910_v54 = vmul.f32 -1.442695, %v4001_v48  ;;  %v3912_v60 = vmul.f32 -1.442695, %v4033_v57 }
 0x8a3   :  { %v3911_v55 = vmul.f32 -1.442695, %v4002_v53  ;;  %4492 = vpow2.f32 %v3908_v51 }
 0x8a4   :  { %4494 = vpow2.f32 %v3910_v54 }
 0x8a5   :  { %4496 = vpow2.f32 %v3911_v55 }
 0x8a6   :  { %4498 = vtanh.f32 %v4032_v58 }
 0x8a7   :  { %4500 = vpow2.f32 %v3909_v59 }
 0x8a8   :  { %4502 = vpow2.f32 %v3912_v60 }
 0x8ac   :  { %v4491_v15 = vpop.eup %4490 }
 0x8ad   :  { %v3486_v63 = vadd.f32 1.0, %v4491_v15  ;;  %v4493_v16 = vpop.eup %4492 }
 0x8ae   :  { %v4495_v1 = vpop.eup %4494  ;;  %v3487_v2 = vadd.f32 1.0, %v4493_v16 }
 0x8af   :  { %4504 = vrcp.f32 %v3486_v63  ;;  %v3489_v3 = vadd.f32 1.0, %v4495_v1  ;;  %v4497_v4 = vpop.eup %4496 }
 0x8b0   :  { %4506 = vtanh.f32 %v4034_v62  ;;  %v3490_v31 = vadd.f32 1.0, %v4497_v4  ;;  %v4499_v5 = vpop.eup %4498 }
 0x8b1   :  { %4508 = vrcp.f32 %v3487_v2  ;;  %v4501_v6 = vpop.eup %4500 }
 0x8b2   :  { %4510 = vrcp.f32 %v3489_v3  ;;  %v4503_v61 = vpop.eup %4502  ;;  %v3488_v25 = vadd.f32 1.0, %v4501_v6 }
 0x8b3   :  { %4512 = vrcp.f32 %v3490_v31  ;;  %v3491_v10 = vadd.f32 1.0, %v4503_v61 }
 0x8b4   :  { %4514 = vrcp.f32 %v3488_v25 }
 0x8b9   :  { %v4505_v7 = vpop.eup %4504 }
 0x8ba   :  { %v4507_v32 = vpop.eup %4506  ;;  %v3508_v52 = vmul.f32 %v4505_v7, %v4499_v5 }
 0x8bb   :  { %v4509_v29 = vpop.eup %4508 }
 0x8bc   :  { %v4511_v35 = vpop.eup %4510  ;;  %v3506_v33 = vmul.f32 %v4509_v29, %v5223_v36 }
 0x8bd   :  { %v3509_v23 = vmul.f32 %v4511_v35, %v4507_v32  ;;  %v4513_v26 = vpop.eup %4512 }
 0x8be   :  { %v3510_v8 = vadd.f32 %v3508_v52, %v3506_v33  ;;  %v3507_v39 = vmul.f32 %v4513_v26, %v5227_v17  ;;  %v4515_v46 = vpop.eup %4514 }
 0x8c0   :  { %4516 = vtanh.f32 %v3510_v8  ;;  %v3511_v42 = vadd.f32 %v3509_v23, %v3507_v39 }
 0x8c1   :  { %4518 = vrcp.f32 %v3491_v10 }
 0x8c2   :  { %4520 = vtanh.f32 %v3511_v42 }
 0x8ca   :  { %v4517_v30 = vpop.eup %4516 }
 0x8cb   :  { %v3514_v34 = vmul.f32 %v4517_v30, %v4515_v46  ;;  %v4519_v9 = vpop.eup %4518 }
 0x8cc   :  { %v4521_v11 = vpop.eup %4520 }
 0x8cd   :  { %v3515_v14 = vmul.f32 %v4521_v11, %v4519_v9 }
 0x8cf   :  { %v3516_v12 = vpack.c.bf16 %v3515_v14, %v3514_v34 }
 0x8d1   :  { %3970 = vst [vmem:[#allocation11 + $0x38] sm:$0xff] %v3516_v12  }
 0x8d2   :  { %4599 = shalt.err (!%p4596_p0)
}
 0x8d3   :  { %s4600_s6 = scalar_lea.hbm %s5259_s4, 1024 }
 0x8d4   :  { %p4601_p1 = scmp.ne.s32.totalorder %s5259_s4, %s4600_s6  ;;  %p4604_p2 = scmp.lt.u32.totalorder %s4600_s6, %s5259_s4 }
 0x8d6   :  { %p4606_p3 = pnand %p4604_p2, %p4601_p1 }
 0x8d8   :  { %4609 = shalt.err (!%p4606_p3)
}
 0x8d9   :  { %3541 = dma.vmem_to_hbm [thread:$0]  %s3536_s26, 1024, %s5259_s4, [#allocation7], %s4620_s1, %s4620_s1, %s4621_s13  }
 0x8da   :  { %4614 = dma.done.wait [#allocation7], 1024  }
 0x8db   :  { %4615 = vsyncadd [#allocation7], 4294966272 }
 0x8dc   :  { %3545 = vsyncpa [#allocation6], 1 }
 0x8dd   :  { %3546 = vsyncpa [#allocation9], 1 }
 0x8de   :  { %3547 = vsyncpa [#allocation7], 1 }

</bundles_post_ra>
